<compile_context>
chip_gen: v7x
topology: tpu7x:2x2x1
jax: 0.10.0
libtpu: 0.0.40
codegen_flags: <defaults>
</compile_context>

<pallas_src>
import numpy as np
import jax
import jax.numpy as jnp
from jax import lax
from jax.experimental import pallas as pl
from jax.experimental.pallas import tpu as pltpu

EPS = 1e-8        # STFTLoss eps (clamp before sqrt)
TILE_MAX = 256    # frame rows per tile (multiple of 8); 2*TILE rows feed the MXU per step
NCORES = 2        # leading "parallel" grid axis (2nd TensorCore on v7x)


def _round_up(n, m):
    return ((n + m - 1) // m) * m


# ----------------------------- Pallas kernel -----------------------------

def _stft_loss_sums_kernel(fxy_ref, cs_hbm_ref, out_ref, cs_vmem, cs_sem):
    i = pl.program_id(1)

    @pl.when(i == 0)
    def _():
        # DFT weights are constant across the grid: copy once into single-buffered VMEM.
        cp = pltpu.make_async_copy(cs_hbm_ref, cs_vmem, cs_sem)
        cp.start()
        cp.wait()
        out_ref[...] = jnp.zeros_like(out_ref)

    tile = fxy_ref.shape[0] // 2
    fp = cs_vmem.shape[1] // 2

    # One fused MXU matmul: x frames stacked on top of y frames, [C | S] as a single RHS.
    z = jnp.dot(fxy_ref[...], cs_vmem[...], preferred_element_type=jnp.float32)

    xr = z[:tile, :fp]
    xi = z[:tile, fp:]
    yr = z[tile:, :fp]
    yi = z[tile:, fp:]

    xm2 = jnp.maximum(xr * xr + xi * xi, EPS)   # x_mag^2 (clamp-before-sqrt semantics)
    ym2 = jnp.maximum(yr * yr + yi * yi, EPS)   # y_mag^2

    # (y_mag - x_mag)^2 == xm2 + ym2 - 2*sqrt(xm2*ym2)  -> one sqrt instead of two
    cross = jnp.sqrt(xm2 * ym2)
    sq_diff = jnp.sum(xm2 + ym2 - 2.0 * cross)
    sq_y = jnp.sum(ym2)
    # |log(x_mag) - log(y_mag)| == 0.5 * |log(xm2) - log(ym2)|
    abs_log = 0.5 * jnp.sum(jnp.abs(jnp.log(xm2) - jnp.log(ym2)))

    row = lax.broadcasted_iota(jnp.int32, (8, 128), 0)
    vec = (jnp.where(row == 0, sq_diff, 0.0)
           + jnp.where(row == 1, sq_y, 0.0)
           + jnp.where(row == 2, abs_log, 0.0))
    out_ref[...] += vec.reshape(1, 8, 128)


def _stft_loss_sums(frames_xy, Cm, Sm):
    """frames_xy: (2, n_valid, n_fft). Returns (sum_sq_diff, sum_sq_y, sum_abs_log, count)."""
    _, n_valid, n_fft = frames_xy.shape
    F = Cm.shape[1]
    Fp = _round_up(F, 128)

    # Fused, lane-dense DFT weights [C | S], each zero-padded to a multiple of 128 lanes.
    CS = jnp.concatenate(
        [jnp.pad(Cm, ((0, 0), (0, Fp - F))), jnp.pad(Sm, ((0, 0), (0, Fp - F)))], axis=1)

    tile = min(TILE_MAX, _round_up(max(1, -(-n_valid // NCORES)), 8))
    tiles_per_core = -(-n_valid // (NCORES * tile))
    num_tiles = NCORES * tiles_per_core
    n_pad_total = num_tiles * tile

    # Pad, then interleave per tile: rows [g*2*tile, g*2*tile + tile) are the x frames of
    # tile g, the next `tile` rows the matching y frames -> kernel block is a plain 2-D slab
    # (no in-kernel reshape).  XLA fuses this layout shuffle into the framing gather.
    fxy = jnp.pad(frames_xy, ((0, 0), (0, n_pad_total - n_valid), (0, 0)))
    fxy = fxy.reshape(2, num_tiles, tile, n_fft).transpose(1, 0, 2, 3)
    fxy = fxy.reshape(num_tiles * 2 * tile, n_fft)

    out = pl.pallas_call(
        _stft_loss_sums_kernel,
        out_shape=jax.ShapeDtypeStruct((NCORES, 8, 128), jnp.float32),
        grid_spec=pltpu.PrefetchScalarGridSpec(
            num_scalar_prefetch=0,
            grid=(NCORES, tiles_per_core),
            in_specs=[
                pl.BlockSpec((2 * tile, n_fft),
                             lambda c, i: (c * tiles_per_core + i, 0)),
                pl.BlockSpec(memory_space=pl.ANY),   # fused [C|S]; copied once to VMEM
            ],
            out_specs=pl.BlockSpec((1, 8, 128), lambda c, i: (c, 0, 0)),
            scratch_shapes=[
                pltpu.VMEM((n_fft, 2 * Fp), jnp.float32),   # resident DFT weights
                pltpu.SemaphoreType.DMA(()),                # weight-copy semaphore
            ],
        ),
        compiler_params=pltpu.CompilerParams(
            dimension_semantics=("parallel", "arbitrary"),
            vmem_limit_bytes=48 * 1024 * 1024,
        ),
    )(fxy, CS)

    sums = jnp.sum(out[:, :3, 0], axis=0)
    sq_diff = sums[0]
    # Padded frame rows / frequency columns contribute exactly EPS each to sum(y_mag^2).
    sq_y = sums[1] - (n_pad_total * Fp - n_valid * F) * EPS
    abs_log = sums[2]
    return sq_diff, sq_y, abs_log, n_valid * F


# ------------------------------ JAX glue ------------------------------

def _windowed_dft_mats(n_fft, win_length):
    """Real-DFT matrices with the (centered, zero-padded) periodic hann window baked in."""
    n = np.arange(win_length)
    w = 0.5 - 0.5 * np.cos(2.0 * np.pi * n / win_length)     # torch.hann_window default
    w_full = np.zeros(n_fft, dtype=np.float64)
    lpad = (n_fft - win_length) // 2                          # torch.stft centers the window
    w_full[lpad:lpad + win_length] = w
    k = np.arange(n_fft)[:, None]
    f = np.arange(n_fft // 2 + 1)[None, :]
    ang = 2.0 * np.pi * k * f / n_fft
    C = (w_full[:, None] * np.cos(ang)).astype(np.float32)
    S = (-(w_full[:, None]) * np.sin(ang)).astype(np.float32)
    return jnp.asarray(C), jnp.asarray(S)


def _frame_signals(xf, yf, n_fft, hop):
    """torch.stft(center=True) framing for x and y, stacked on a leading axis of size 2."""
    pad = n_fft // 2
    T = xf.shape[1]
    sig = jnp.stack([xf, yf], axis=0)                          # (2, BC, T)
    padded = jnp.pad(sig, ((0, 0), (0, 0), (pad, pad)), mode="reflect")
    num_frames = 1 + T // hop
    idx = (jnp.arange(num_frames) * hop)[:, None] + jnp.arange(n_fft)[None, :]
    frames = padded[:, :, idx]                                 # (2, BC, num_frames, n_fft)
    # TODO(synk): move framing into the kernel (hop-strided DMA from the padded signal)
    # to avoid materializing the ~n_fft/hop-times duplicated frame matrix in HBM.
    return frames.reshape(2, -1, n_fft)


def multi_resolution_stft_loss(x, y, n_ffts, hop_lengths, win_lengths,
                               lambda_sc=1.0, lambda_log_mag=1.0):
    """Forward pass of MultiResolutionSTFTLoss (defaults: lambda_lin_mag=0, lambda_phase=0)."""
    B, Cc, T = x.shape
    xf = x.reshape(B * Cc, T).astype(jnp.float32)
    yf = y.reshape(B * Cc, T).astype(jnp.float32)

    total, sc_list, log_list = [], [], []
    for n_fft, hop, win in zip(n_ffts, hop_lengths, win_lengths):
        Cm, Sm = _windowed_dft_mats(n_fft, win)
        frames_xy = _frame_signals(xf, yf, n_fft, hop)
        sq_diff, sq_y, abs_log, count = _stft_loss_sums(frames_xy, Cm, Sm)
        sc = jnp.sqrt(jnp.maximum(sq_diff, 0.0)) / jnp.sqrt(sq_y)   # SpectralConvergenceLoss
        log_mag = abs_log / count                                    # STFTMagnitudeLoss(log, L1, mean)
        total.append(lambda_sc * sc + lambda_log_mag * log_mag)
        sc_list.append(sc)
        log_list.append(log_mag)

    total_loss = jnp.mean(jnp.stack(total))
    losses = {
        "sc_mag_loss": jnp.mean(jnp.stack(sc_list)),
        "log_mag_loss": jnp.mean(jnp.stack(log_list)),
        "lin_mag_loss": jnp.float32(0.0),   # lambda_lin_mag = 0.0 (module default)
        "phs_loss": jnp.float32(0.0),       # lambda_phase = 0.0 (module default)
    }
    return total_loss, losses


# Pure-JAX reference (same math, no Pallas) for a correctness check.
def _reference_loss(x, y, n_ffts, hop_lengths, win_lengths):
    B, Cc, T = x.shape
    xf = x.reshape(B * Cc, T).astype(jnp.float32)
    yf = y.reshape(B * Cc, T).astype(jnp.float32)
    total = []
    for n_fft, hop, win in zip(n_ffts, hop_lengths, win_lengths):
        Cm, Sm = _windowed_dft_mats(n_fft, win)
        fr = _frame_signals(xf, yf, n_fft, hop)
        frx, fry = fr[0], fr[1]
        x_mag = jnp.sqrt(jnp.maximum((frx @ Cm) ** 2 + (frx @ Sm) ** 2, EPS))
        y_mag = jnp.sqrt(jnp.maximum((fry @ Cm) ** 2 + (fry @ Sm) ** 2, EPS))
        sc = jnp.linalg.norm(y_mag - x_mag) / jnp.linalg.norm(y_mag)
        log_mag = jnp.mean(jnp.abs(jnp.log(x_mag) - jnp.log(y_mag)))
        total.append(sc + log_mag)
    return jnp.mean(jnp.stack(total))


if __name__ == "__main__":
    # Small shapes consistent with the module: batch=2, channels=1, T=1024 audio.
    key = jax.random.PRNGKey(0)
    kx, ky = jax.random.split(key)
    B, C, T = 2, 1, 1024
    x = jax.random.normal(kx, (B, C, T), dtype=jnp.float32)
    y = x + 0.1 * jax.random.normal(ky, (B, C, T), dtype=jnp.float32)

    # Scaled-down multi-resolution config (module defaults use 1024/2048/512).
    n_ffts = [128, 256, 64]
    hop_lengths = [32, 64, 16]
    win_lengths = [96, 192, 48]

    loss_fn = jax.jit(lambda a, b: multi_resolution_stft_loss(
        a, b, n_ffts, hop_lengths, win_lengths))
    total_loss, losses = loss_fn(x, y)
    total_loss = jax.block_until_ready(total_loss)
    jax.block_until_ready(losses)

    ref = jax.block_until_ready(_reference_loss(x, y, n_ffts, hop_lengths, win_lengths))
    assert np.isfinite(float(total_loss))
    assert np.allclose(float(total_loss), float(ref), rtol=2e-3, atol=1e-4), (total_loss, ref)

    print("KERNEL_OK")
</pallas_src>

<mosaic_0001>
module attributes {stable_mosaic.version = 11 : i64} {
  func.func @_stft_loss_sums_kernel(%arg0: i32, %arg1: i32, %arg2: memref<80x128xf32, #tpu.memory_space<vmem>>, %arg3: memref<128x256xf32, #tpu.memory_space<any>>, %arg4: memref<1x8x128xf32, #tpu.memory_space<vmem>>, %arg5: memref<128x256xf32, #tpu.memory_space<vmem>>, %arg6: memref<!tpu.dma_semaphore, #tpu.memory_space<semaphore_mem>>) attributes {dimension_semantics = [#tpu.dimension_semantics<parallel>, #tpu.dimension_semantics<arbitrary>], iteration_bounds = array<i64: 2, 1>, scalar_prefetch = 0 : i64, scratch_operands = 2 : i64, tpu.core_type = #tpu.core_type<tc>, window_params = [{transform_indices = @transform_0, window_bounds = array<i64: 80, 128>}, {}, {transform_indices = @transform_2, window_bounds = array<i64: 1, 8, 128>}]} {
    %c0_i32 = arith.constant 0 : i32
    %0 = arith.cmpi eq, %arg1, %c0_i32 : i32
    %1 = arith.extui %0 : i1 to i32
    %c0_i32_0 = arith.constant 0 : i32
    %2 = arith.cmpi ne, %1, %c0_i32_0 : i32
    scf.if %2 {
      tpu.enqueue_dma source(%arg3 : memref<128x256xf32, #tpu.memory_space<any>>) target(%arg5 : memref<128x256xf32, #tpu.memory_space<vmem>>) target_semaphore(%arg6 : memref<!tpu.dma_semaphore, #tpu.memory_space<semaphore_mem>>)
      tpu.wait_dma2 semaphore(%arg6 : memref<!tpu.dma_semaphore, #tpu.memory_space<semaphore_mem>>) src(%arg3 : memref<128x256xf32, #tpu.memory_space<any>>) dst(%arg5 : memref<128x256xf32, #tpu.memory_space<vmem>>)
      %cst_21 = arith.constant 0.000000e+00 : f32
      %65 = vector.broadcast %cst_21 : f32 to vector<1x8x128xf32>
      %c0_22 = arith.constant 0 : index
      %c0_23 = arith.constant 0 : index
      %c0_24 = arith.constant 0 : index
      %66 = vector.load %arg4[%c0_22, %c0_23, %c0_24] : memref<1x8x128xf32, #tpu.memory_space<vmem>>, vector<1x8x128xf32>
      tpu.vector_store %arg4[%c0_22, %c0_23, %c0_24], %65 {strides = array<i32>} : memref<1x8x128xf32, #tpu.memory_space<vmem>>, vector<1x8x128xf32>,
    } else {
    }
    %c0 = arith.constant 0 : index
    %c0_1 = arith.constant 0 : index
    %3 = vector.load %arg2[%c0, %c0_1] : memref<80x128xf32, #tpu.memory_space<vmem>>, vector<80x128xf32>
    %c0_2 = arith.constant 0 : index
    %c0_3 = arith.constant 0 : index
    %4 = vector.load %arg5[%c0_2, %c0_3] : memref<128x256xf32, #tpu.memory_space<vmem>>, vector<128x256xf32>
    %cst = arith.constant dense<0.000000e+00> : vector<80x256xf32>
    %5 = tpu.matmul %3, %4, %cst {dimension_numbers = #tpu.dot_dimension_numbers<[1], [0], [0], [1], [0, 0, 1, 1], [], []>} : vector<80x128xf32>, vector<128x256xf32>, vector<80x256xf32> -> vector<80x256xf32>
    %6 = vector.extract_strided_slice %5 {offsets = [0, 0], sizes = [40, 128], strides = [1, 1]} : vector<80x256xf32> to vector<40x128xf32>
    %7 = vector.extract_strided_slice %5 {offsets = [0, 128], sizes = [40, 128], strides = [1, 1]} : vector<80x256xf32> to vector<40x128xf32>
    %8 = vector.extract_strided_slice %5 {offsets = [40, 0], sizes = [40, 128], strides = [1, 1]} : vector<80x256xf32> to vector<40x128xf32>
    %9 = vector.extract_strided_slice %5 {offsets = [40, 128], sizes = [40, 128], strides = [1, 1]} : vector<80x256xf32> to vector<40x128xf32>
    %10 = arith.mulf %6, %6 : vector<40x128xf32>
    %11 = arith.mulf %7, %7 : vector<40x128xf32>
    %12 = arith.addf %10, %11 : vector<40x128xf32>
    %cst_4 = arith.constant 9.99999993E-9 : f32
    %13 = vector.broadcast %cst_4 : f32 to vector<40x128xf32>
    %14 = arith.maximumf %12, %13 : vector<40x128xf32>
    %15 = arith.mulf %8, %8 : vector<40x128xf32>
    %16 = arith.mulf %9, %9 : vector<40x128xf32>
    %17 = arith.addf %15, %16 : vector<40x128xf32>
    %cst_5 = arith.constant 9.99999993E-9 : f32
    %18 = vector.broadcast %cst_5 : f32 to vector<40x128xf32>
    %19 = arith.maximumf %17, %18 : vector<40x128xf32>
    %20 = arith.mulf %14, %19 : vector<40x128xf32>
    %21 = math.sqrt %20 : vector<40x128xf32>
    %22 = arith.addf %14, %19 : vector<40x128xf32>
    %cst_6 = arith.constant 2.000000e+00 : f32
    %23 = vector.broadcast %cst_6 : f32 to vector<40x128xf32>
    %24 = arith.mulf %23, %21 : vector<40x128xf32>
    %25 = arith.subf %22, %24 : vector<40x128xf32>
    %26 = vector.shape_cast %25 : vector<40x128xf32> to vector<1x40x128xf32>
    %cst_7 = arith.constant dense<0.000000e+00> : vector<1xf32>
    %27 = vector.multi_reduction <add>, %26, %cst_7 [1, 2] : vector<1x40x128xf32> to vector<1xf32>
    %28 = vector.shape_cast %27 : vector<1xf32> to vector<1x1x1xf32>
    %29 = vector.extract %28[0, 0, 0] : f32 from vector<1x1x1xf32>
    %30 = vector.shape_cast %19 : vector<40x128xf32> to vector<1x40x128xf32>
    %cst_8 = arith.constant dense<0.000000e+00> : vector<1xf32>
    %31 = vector.multi_reduction <add>, %30, %cst_8 [1, 2] : vector<1x40x128xf32> to vector<1xf32>
    %32 = vector.shape_cast %31 : vector<1xf32> to vector<1x1x1xf32>
    %33 = vector.extract %32[0, 0, 0] : f32 from vector<1x1x1xf32>
    %34 = math.log %14 : vector<40x128xf32>
    %35 = math.log %19 : vector<40x128xf32>
    %36 = arith.subf %34, %35 : vector<40x128xf32>
    %37 = math.absf %36 : vector<40x128xf32>
    %38 = vector.shape_cast %37 : vector<40x128xf32> to vector<1x40x128xf32>
    %cst_9 = arith.constant dense<0.000000e+00> : vector<1xf32>
    %39 = vector.multi_reduction <add>, %38, %cst_9 [1, 2] : vector<1x40x128xf32> to vector<1xf32>
    %40 = vector.shape_cast %39 : vector<1xf32> to vector<1x1x1xf32>
    %41 = vector.extract %40[0, 0, 0] : f32 from vector<1x1x1xf32>
    %cst_10 = arith.constant 5.000000e-01 : f32
    %42 = arith.mulf %cst_10, %41 : f32
    %43 = tpu.iota {dimensions = array<i32: 0>} : vector<8x128xi32>
    %c0_i32_11 = arith.constant 0 : i32
    %44 = vector.broadcast %c0_i32_11 : i32 to vector<8x128xi32>
    %45 = arith.cmpi eq, %43, %44 : vector<8x128xi32>
    %cst_12 = arith.constant 0.000000e+00 : f32
    %46 = vector.broadcast %29 : f32 to vector<8x128xf32>
    %47 = vector.broadcast %cst_12 : f32 to vector<8x128xf32>
    %48 = arith.select %45, %46, %47 : vector<8x128xi1>, vector<8x128xf32>
    %c1_i32 = arith.constant 1 : i32
    %49 = vector.broadcast %c1_i32 : i32 to vector<8x128xi32>
    %50 = arith.cmpi eq, %43, %49 : vector<8x128xi32>
    %cst_13 = arith.constant 0.000000e+00 : f32
    %51 = vector.broadcast %33 : f32 to vector<8x128xf32>
    %52 = vector.broadcast %cst_13 : f32 to vector<8x128xf32>
    %53 = arith.select %50, %51, %52 : vector<8x128xi1>, vector<8x128xf32>
    %54 = arith.addf %48, %53 : vector<8x128xf32>
    %c2_i32 = arith.constant 2 : i32
    %55 = vector.broadcast %c2_i32 : i32 to vector<8x128xi32>
    %56 = arith.cmpi eq, %43, %55 : vector<8x128xi32>
    %cst_14 = arith.constant 0.000000e+00 : f32
    %57 = vector.broadcast %42 : f32 to vector<8x128xf32>
    %58 = vector.broadcast %cst_14 : f32 to vector<8x128xf32>
    %59 = arith.select %56, %57, %58 : vector<8x128xi1>, vector<8x128xf32>
    %60 = arith.addf %54, %59 : vector<8x128xf32>
    %c0_15 = arith.constant 0 : index
    %c0_16 = arith.constant 0 : index
    %c0_17 = arith.constant 0 : index
    %61 = vector.load %arg4[%c0_15, %c0_16, %c0_17] : memref<1x8x128xf32, #tpu.memory_space<vmem>>, vector<1x8x128xf32>
    %62 = vector.shape_cast %60 : vector<8x128xf32> to vector<1x8x128xf32>
    %63 = arith.addf %61, %62 : vector<1x8x128xf32>
    %c0_18 = arith.constant 0 : index
    %c0_19 = arith.constant 0 : index
    %c0_20 = arith.constant 0 : index
    %64 = vector.load %arg4[%c0_18, %c0_19, %c0_20] : memref<1x8x128xf32, #tpu.memory_space<vmem>>, vector<1x8x128xf32>
    tpu.vector_store %arg4[%c0_18, %c0_19, %c0_20], %63 {strides = array<i32>} : memref<1x8x128xf32, #tpu.memory_space<vmem>>, vector<1x8x128xf32>,
    return
  }
  func.func @transform_0(%arg0: i32, %arg1: i32) -> (i32, i32) {
    %c1_i32 = arith.constant 1 : i32
    %0 = arith.muli %arg0, %c1_i32 : i32
    %1 = arith.addi %0, %arg1 : i32
    %c0_i32 = arith.constant 0 : i32
    %c0_i32_0 = arith.constant 0 : i32
    return %1, %c0_i32 : i32, i32
  }
  func.func @transform_2(%arg0: i32, %arg1: i32) -> (i32, i32, i32) {
    %c0_i32 = arith.constant 0 : i32
    %c0_i32_0 = arith.constant 0 : i32
    %c0_i32_1 = arith.constant 0 : i32
    return %arg0, %c0_i32, %c0_i32_0 : i32, i32, i32
  }
}

module attributes {stable_mosaic.version = 11 : i64} {
  func.func @_stft_loss_sums_kernel(%arg0: i32, %arg1: i32, %arg2: memref<144x64xf32, #tpu.memory_space<vmem>>, %arg3: memref<64x256xf32, #tpu.memory_space<any>>, %arg4: memref<1x8x128xf32, #tpu.memory_space<vmem>>, %arg5: memref<64x256xf32, #tpu.memory_space<vmem>>, %arg6: memref<!tpu.dma_semaphore, #tpu.memory_space<semaphore_mem>>) attributes {dimension_semantics = [#tpu.dimension_semantics<parallel>, #tpu.dimension_semantics<arbitrary>], iteration_bounds = array<i64: 2, 1>, scalar_prefetch = 0 : i64, scratch_operands = 2 : i64, tpu.core_type = #tpu.core_type<tc>, window_params = [{transform_indices = @transform_0, window_bounds = array<i64: 144, 64>}, {}, {transform_indices = @transform_2, window_bounds = array<i64: 1, 8, 128>}]} {
    %c0_i32 = arith.constant 0 : i32
    %0 = arith.cmpi eq, %arg1, %c0_i32 : i32
    %1 = arith.extui %0 : i1 to i32
    %c0_i32_0 = arith.constant 0 : i32
    %2 = arith.cmpi ne, %1, %c0_i32_0 : i32
    scf.if %2 {
      tpu.enqueue_dma source(%arg3 : memref<64x256xf32, #tpu.memory_space<any>>) target(%arg5 : memref<64x256xf32, #tpu.memory_space<vmem>>) target_semaphore(%arg6 : memref<!tpu.dma_semaphore, #tpu.memory_space<semaphore_mem>>)
      tpu.wait_dma2 semaphore(%arg6 : memref<!tpu.dma_semaphore, #tpu.memory_space<semaphore_mem>>) src(%arg3 : memref<64x256xf32, #tpu.memory_space<any>>) dst(%arg5 : memref<64x256xf32, #tpu.memory_space<vmem>>)
      %cst_21 = arith.constant 0.000000e+00 : f32
      %65 = vector.broadcast %cst_21 : f32 to vector<1x8x128xf32>
      %c0_22 = arith.constant 0 : index
      %c0_23 = arith.constant 0 : index
      %c0_24 = arith.constant 0 : index
      %66 = vector.load %arg4[%c0_22, %c0_23, %c0_24] : memref<1x8x128xf32, #tpu.memory_space<vmem>>, vector<1x8x128xf32>
      tpu.vector_store %arg4[%c0_22, %c0_23, %c0_24], %65 {strides = array<i32>} : memref<1x8x128xf32, #tpu.memory_space<vmem>>, vector<1x8x128xf32>,
    } else {
    }
    %c0 = arith.constant 0 : index
    %c0_1 = arith.constant 0 : index
    %3 = vector.load %arg2[%c0, %c0_1] : memref<144x64xf32, #tpu.memory_space<vmem>>, vector<144x64xf32>
    %c0_2 = arith.constant 0 : index
    %c0_3 = arith.constant 0 : index
    %4 = vector.load %arg5[%c0_2, %c0_3] : memref<64x256xf32, #tpu.memory_space<vmem>>, vector<64x256xf32>
    %cst = arith.constant dense<0.000000e+00> : vector<144x256xf32>
    %5 = tpu.matmul %3, %4, %cst {dimension_numbers = #tpu.dot_dimension_numbers<[1], [0], [0], [1], [0, 0, 1, 1], [], []>} : vector<144x64xf32>, vector<64x256xf32>, vector<144x256xf32> -> vector<144x256xf32>
    %6 = vector.extract_strided_slice %5 {offsets = [0, 0], sizes = [72, 128], strides = [1, 1]} : vector<144x256xf32> to vector<72x128xf32>
    %7 = vector.extract_strided_slice %5 {offsets = [0, 128], sizes = [72, 128], strides = [1, 1]} : vector<144x256xf32> to vector<72x128xf32>
    %8 = vector.extract_strided_slice %5 {offsets = [72, 0], sizes = [72, 128], strides = [1, 1]} : vector<144x256xf32> to vector<72x128xf32>
    %9 = vector.extract_strided_slice %5 {offsets = [72, 128], sizes = [72, 128], strides = [1, 1]} : vector<144x256xf32> to vector<72x128xf32>
    %10 = arith.mulf %6, %6 : vector<72x128xf32>
    %11 = arith.mulf %7, %7 : vector<72x128xf32>
    %12 = arith.addf %10, %11 : vector<72x128xf32>
    %cst_4 = arith.constant 9.99999993E-9 : f32
    %13 = vector.broadcast %cst_4 : f32 to vector<72x128xf32>
    %14 = arith.maximumf %12, %13 : vector<72x128xf32>
    %15 = arith.mulf %8, %8 : vector<72x128xf32>
    %16 = arith.mulf %9, %9 : vector<72x128xf32>
    %17 = arith.addf %15, %16 : vector<72x128xf32>
    %cst_5 = arith.constant 9.99999993E-9 : f32
    %18 = vector.broadcast %cst_5 : f32 to vector<72x128xf32>
    %19 = arith.maximumf %17, %18 : vector<72x128xf32>
    %20 = arith.mulf %14, %19 : vector<72x128xf32>
    %21 = math.sqrt %20 : vector<72x128xf32>
    %22 = arith.addf %14, %19 : vector<72x128xf32>
    %cst_6 = arith.constant 2.000000e+00 : f32
    %23 = vector.broadcast %cst_6 : f32 to vector<72x128xf32>
    %24 = arith.mulf %23, %21 : vector<72x128xf32>
    %25 = arith.subf %22, %24 : vector<72x128xf32>
    %26 = vector.shape_cast %25 : vector<72x128xf32> to vector<1x72x128xf32>
    %cst_7 = arith.constant dense<0.000000e+00> : vector<1xf32>
    %27 = vector.multi_reduction <add>, %26, %cst_7 [1, 2] : vector<1x72x128xf32> to vector<1xf32>
    %28 = vector.shape_cast %27 : vector<1xf32> to vector<1x1x1xf32>
    %29 = vector.extract %28[0, 0, 0] : f32 from vector<1x1x1xf32>
    %30 = vector.shape_cast %19 : vector<72x128xf32> to vector<1x72x128xf32>
    %cst_8 = arith.constant dense<0.000000e+00> : vector<1xf32>
    %31 = vector.multi_reduction <add>, %30, %cst_8 [1, 2] : vector<1x72x128xf32> to vector<1xf32>
    %32 = vector.shape_cast %31 : vector<1xf32> to vector<1x1x1xf32>
    %33 = vector.extract %32[0, 0, 0] : f32 from vector<1x1x1xf32>
    %34 = math.log %14 : vector<72x128xf32>
    %35 = math.log %19 : vector<72x128xf32>
    %36 = arith.subf %34, %35 : vector<72x128xf32>
    %37 = math.absf %36 : vector<72x128xf32>
    %38 = vector.shape_cast %37 : vector<72x128xf32> to vector<1x72x128xf32>
    %cst_9 = arith.constant dense<0.000000e+00> : vector<1xf32>
    %39 = vector.multi_reduction <add>, %38, %cst_9 [1, 2] : vector<1x72x128xf32> to vector<1xf32>
    %40 = vector.shape_cast %39 : vector<1xf32> to vector<1x1x1xf32>
    %41 = vector.extract %40[0, 0, 0] : f32 from vector<1x1x1xf32>
    %cst_10 = arith.constant 5.000000e-01 : f32
    %42 = arith.mulf %cst_10, %41 : f32
    %43 = tpu.iota {dimensions = array<i32: 0>} : vector<8x128xi32>
    %c0_i32_11 = arith.constant 0 : i32
    %44 = vector.broadcast %c0_i32_11 : i32 to vector<8x128xi32>
    %45 = arith.cmpi eq, %43, %44 : vector<8x128xi32>
    %cst_12 = arith.constant 0.000000e+00 : f32
    %46 = vector.broadcast %29 : f32 to vector<8x128xf32>
    %47 = vector.broadcast %cst_12 : f32 to vector<8x128xf32>
    %48 = arith.select %45, %46, %47 : vector<8x128xi1>, vector<8x128xf32>
    %c1_i32 = arith.constant 1 : i32
    %49 = vector.broadcast %c1_i32 : i32 to vector<8x128xi32>
    %50 = arith.cmpi eq, %43, %49 : vector<8x128xi32>
    %cst_13 = arith.constant 0.000000e+00 : f32
    %51 = vector.broadcast %33 : f32 to vector<8x128xf32>
    %52 = vector.broadcast %cst_13 : f32 to vector<8x128xf32>
    %53 = arith.select %50, %51, %52 : vector<8x128xi1>, vector<8x128xf32>
    %54 = arith.addf %48, %53 : vector<8x128xf32>
    %c2_i32 = arith.constant 2 : i32
    %55 = vector.broadcast %c2_i32 : i32 to vector<8x128xi32>
    %56 = arith.cmpi eq, %43, %55 : vector<8x128xi32>
    %cst_14 = arith.constant 0.000000e+00 : f32
    %57 = vector.broadcast %42 : f32 to vector<8x128xf32>
    %58 = vector.broadcast %cst_14 : f32 to vector<8x128xf32>
    %59 = arith.select %56, %57, %58 : vector<8x128xi1>, vector<8x128xf32>
    %60 = arith.addf %54, %59 : vector<8x128xf32>
    %c0_15 = arith.constant 0 : index
    %c0_16 = arith.constant 0 : index
    %c0_17 = arith.constant 0 : index
    %61 = vector.load %arg4[%c0_15, %c0_16, %c0_17] : memref<1x8x128xf32, #tpu.memory_space<vmem>>, vector<1x8x128xf32>
    %62 = vector.shape_cast %60 : vector<8x128xf32> to vector<1x8x128xf32>
    %63 = arith.addf %61, %62 : vector<1x8x128xf32>
    %c0_18 = arith.constant 0 : index
    %c0_19 = arith.constant 0 : index
    %c0_20 = arith.constant 0 : index
    %64 = vector.load %arg4[%c0_18, %c0_19, %c0_20] : memref<1x8x128xf32, #tpu.memory_space<vmem>>, vector<1x8x128xf32>
    tpu.vector_store %arg4[%c0_18, %c0_19, %c0_20], %63 {strides = array<i32>} : memref<1x8x128xf32, #tpu.memory_space<vmem>>, vector<1x8x128xf32>,
    return
  }
  func.func @transform_0(%arg0: i32, %arg1: i32) -> (i32, i32) {
    %c1_i32 = arith.constant 1 : i32
    %0 = arith.muli %arg0, %c1_i32 : i32
    %1 = arith.addi %0, %arg1 : i32
    %c0_i32 = arith.constant 0 : i32
    %c0_i32_0 = arith.constant 0 : i32
    return %1, %c0_i32 : i32, i32
  }
  func.func @transform_2(%arg0: i32, %arg1: i32) -> (i32, i32, i32) {
    %c0_i32 = arith.constant 0 : i32
    %c0_i32_0 = arith.constant 0 : i32
    %c0_i32_1 = arith.constant 0 : i32
    return %arg0, %c0_i32, %c0_i32_0 : i32, i32, i32
  }
}

module attributes {stable_mosaic.version = 11 : i64} {
  func.func @_stft_loss_sums_kernel(%arg0: i32, %arg1: i32, %arg2: memref<48x256xf32, #tpu.memory_space<vmem>>, %arg3: memref<256x512xf32, #tpu.memory_space<any>>, %arg4: memref<1x8x128xf32, #tpu.memory_space<vmem>>, %arg5: memref<256x512xf32, #tpu.memory_space<vmem>>, %arg6: memref<!tpu.dma_semaphore, #tpu.memory_space<semaphore_mem>>) attributes {dimension_semantics = [#tpu.dimension_semantics<parallel>, #tpu.dimension_semantics<arbitrary>], iteration_bounds = array<i64: 2, 1>, scalar_prefetch = 0 : i64, scratch_operands = 2 : i64, tpu.core_type = #tpu.core_type<tc>, window_params = [{transform_indices = @transform_0, window_bounds = array<i64: 48, 256>}, {}, {transform_indices = @transform_2, window_bounds = array<i64: 1, 8, 128>}]} {
    %c0_i32 = arith.constant 0 : i32
    %0 = arith.cmpi eq, %arg1, %c0_i32 : i32
    %1 = arith.extui %0 : i1 to i32
    %c0_i32_0 = arith.constant 0 : i32
    %2 = arith.cmpi ne, %1, %c0_i32_0 : i32
    scf.if %2 {
      tpu.enqueue_dma source(%arg3 : memref<256x512xf32, #tpu.memory_space<any>>) target(%arg5 : memref<256x512xf32, #tpu.memory_space<vmem>>) target_semaphore(%arg6 : memref<!tpu.dma_semaphore, #tpu.memory_space<semaphore_mem>>)
      tpu.wait_dma2 semaphore(%arg6 : memref<!tpu.dma_semaphore, #tpu.memory_space<semaphore_mem>>) src(%arg3 : memref<256x512xf32, #tpu.memory_space<any>>) dst(%arg5 : memref<256x512xf32, #tpu.memory_space<vmem>>)
      %cst_21 = arith.constant 0.000000e+00 : f32
      %65 = vector.broadcast %cst_21 : f32 to vector<1x8x128xf32>
      %c0_22 = arith.constant 0 : index
      %c0_23 = arith.constant 0 : index
      %c0_24 = arith.constant 0 : index
      %66 = vector.load %arg4[%c0_22, %c0_23, %c0_24] : memref<1x8x128xf32, #tpu.memory_space<vmem>>, vector<1x8x128xf32>
      tpu.vector_store %arg4[%c0_22, %c0_23, %c0_24], %65 {strides = array<i32>} : memref<1x8x128xf32, #tpu.memory_space<vmem>>, vector<1x8x128xf32>,
    } else {
    }
    %c0 = arith.constant 0 : index
    %c0_1 = arith.constant 0 : index
    %3 = vector.load %arg2[%c0, %c0_1] : memref<48x256xf32, #tpu.memory_space<vmem>>, vector<48x256xf32>
    %c0_2 = arith.constant 0 : index
    %c0_3 = arith.constant 0 : index
    %4 = vector.load %arg5[%c0_2, %c0_3] : memref<256x512xf32, #tpu.memory_space<vmem>>, vector<256x512xf32>
    %cst = arith.constant dense<0.000000e+00> : vector<48x512xf32>
    %5 = tpu.matmul %3, %4, %cst {dimension_numbers = #tpu.dot_dimension_numbers<[1], [0], [0], [1], [0, 0, 1, 1], [], []>} : vector<48x256xf32>, vector<256x512xf32>, vector<48x512xf32> -> vector<48x512xf32>
    %6 = vector.extract_strided_slice %5 {offsets = [0, 0], sizes = [24, 256], strides = [1, 1]} : vector<48x512xf32> to vector<24x256xf32>
    %7 = vector.extract_strided_slice %5 {offsets = [0, 256], sizes = [24, 256], strides = [1, 1]} : vector<48x512xf32> to vector<24x256xf32>
    %8 = vector.extract_strided_slice %5 {offsets = [24, 0], sizes = [24, 256], strides = [1, 1]} : vector<48x512xf32> to vector<24x256xf32>
    %9 = vector.extract_strided_slice %5 {offsets = [24, 256], sizes = [24, 256], strides = [1, 1]} : vector<48x512xf32> to vector<24x256xf32>
    %10 = arith.mulf %6, %6 : vector<24x256xf32>
    %11 = arith.mulf %7, %7 : vector<24x256xf32>
    %12 = arith.addf %10, %11 : vector<24x256xf32>
    %cst_4 = arith.constant 9.99999993E-9 : f32
    %13 = vector.broadcast %cst_4 : f32 to vector<24x256xf32>
    %14 = arith.maximumf %12, %13 : vector<24x256xf32>
    %15 = arith.mulf %8, %8 : vector<24x256xf32>
    %16 = arith.mulf %9, %9 : vector<24x256xf32>
    %17 = arith.addf %15, %16 : vector<24x256xf32>
    %cst_5 = arith.constant 9.99999993E-9 : f32
    %18 = vector.broadcast %cst_5 : f32 to vector<24x256xf32>
    %19 = arith.maximumf %17, %18 : vector<24x256xf32>
    %20 = arith.mulf %14, %19 : vector<24x256xf32>
    %21 = math.sqrt %20 : vector<24x256xf32>
    %22 = arith.addf %14, %19 : vector<24x256xf32>
    %cst_6 = arith.constant 2.000000e+00 : f32
    %23 = vector.broadcast %cst_6 : f32 to vector<24x256xf32>
    %24 = arith.mulf %23, %21 : vector<24x256xf32>
    %25 = arith.subf %22, %24 : vector<24x256xf32>
    %26 = vector.shape_cast %25 : vector<24x256xf32> to vector<1x24x256xf32>
    %cst_7 = arith.constant dense<0.000000e+00> : vector<1xf32>
    %27 = vector.multi_reduction <add>, %26, %cst_7 [1, 2] : vector<1x24x256xf32> to vector<1xf32>
    %28 = vector.shape_cast %27 : vector<1xf32> to vector<1x1x1xf32>
    %29 = vector.extract %28[0, 0, 0] : f32 from vector<1x1x1xf32>
    %30 = vector.shape_cast %19 : vector<24x256xf32> to vector<1x24x256xf32>
    %cst_8 = arith.constant dense<0.000000e+00> : vector<1xf32>
    %31 = vector.multi_reduction <add>, %30, %cst_8 [1, 2] : vector<1x24x256xf32> to vector<1xf32>
    %32 = vector.shape_cast %31 : vector<1xf32> to vector<1x1x1xf32>
    %33 = vector.extract %32[0, 0, 0] : f32 from vector<1x1x1xf32>
    %34 = math.log %14 : vector<24x256xf32>
    %35 = math.log %19 : vector<24x256xf32>
    %36 = arith.subf %34, %35 : vector<24x256xf32>
    %37 = math.absf %36 : vector<24x256xf32>
    %38 = vector.shape_cast %37 : vector<24x256xf32> to vector<1x24x256xf32>
    %cst_9 = arith.constant dense<0.000000e+00> : vector<1xf32>
    %39 = vector.multi_reduction <add>, %38, %cst_9 [1, 2] : vector<1x24x256xf32> to vector<1xf32>
    %40 = vector.shape_cast %39 : vector<1xf32> to vector<1x1x1xf32>
    %41 = vector.extract %40[0, 0, 0] : f32 from vector<1x1x1xf32>
    %cst_10 = arith.constant 5.000000e-01 : f32
    %42 = arith.mulf %cst_10, %41 : f32
    %43 = tpu.iota {dimensions = array<i32: 0>} : vector<8x128xi32>
    %c0_i32_11 = arith.constant 0 : i32
    %44 = vector.broadcast %c0_i32_11 : i32 to vector<8x128xi32>
    %45 = arith.cmpi eq, %43, %44 : vector<8x128xi32>
    %cst_12 = arith.constant 0.000000e+00 : f32
    %46 = vector.broadcast %29 : f32 to vector<8x128xf32>
    %47 = vector.broadcast %cst_12 : f32 to vector<8x128xf32>
    %48 = arith.select %45, %46, %47 : vector<8x128xi1>, vector<8x128xf32>
    %c1_i32 = arith.constant 1 : i32
    %49 = vector.broadcast %c1_i32 : i32 to vector<8x128xi32>
    %50 = arith.cmpi eq, %43, %49 : vector<8x128xi32>
    %cst_13 = arith.constant 0.000000e+00 : f32
    %51 = vector.broadcast %33 : f32 to vector<8x128xf32>
    %52 = vector.broadcast %cst_13 : f32 to vector<8x128xf32>
    %53 = arith.select %50, %51, %52 : vector<8x128xi1>, vector<8x128xf32>
    %54 = arith.addf %48, %53 : vector<8x128xf32>
    %c2_i32 = arith.constant 2 : i32
    %55 = vector.broadcast %c2_i32 : i32 to vector<8x128xi32>
    %56 = arith.cmpi eq, %43, %55 : vector<8x128xi32>
    %cst_14 = arith.constant 0.000000e+00 : f32
    %57 = vector.broadcast %42 : f32 to vector<8x128xf32>
    %58 = vector.broadcast %cst_14 : f32 to vector<8x128xf32>
    %59 = arith.select %56, %57, %58 : vector<8x128xi1>, vector<8x128xf32>
    %60 = arith.addf %54, %59 : vector<8x128xf32>
    %c0_15 = arith.constant 0 : index
    %c0_16 = arith.constant 0 : index
    %c0_17 = arith.constant 0 : index
    %61 = vector.load %arg4[%c0_15, %c0_16, %c0_17] : memref<1x8x128xf32, #tpu.memory_space<vmem>>, vector<1x8x128xf32>
    %62 = vector.shape_cast %60 : vector<8x128xf32> to vector<1x8x128xf32>
    %63 = arith.addf %61, %62 : vector<1x8x128xf32>
    %c0_18 = arith.constant 0 : index
    %c0_19 = arith.constant 0 : index
    %c0_20 = arith.constant 0 : index
    %64 = vector.load %arg4[%c0_18, %c0_19, %c0_20] : memref<1x8x128xf32, #tpu.memory_space<vmem>>, vector<1x8x128xf32>
    tpu.vector_store %arg4[%c0_18, %c0_19, %c0_20], %63 {strides = array<i32>} : memref<1x8x128xf32, #tpu.memory_space<vmem>>, vector<1x8x128xf32>,
    return
  }
  func.func @transform_0(%arg0: i32, %arg1: i32) -> (i32, i32) {
    %c1_i32 = arith.constant 1 : i32
    %0 = arith.muli %arg0, %c1_i32 : i32
    %1 = arith.addi %0, %arg1 : i32
    %c0_i32 = arith.constant 0 : i32
    %c0_i32_0 = arith.constant 0 : i32
    return %1, %c0_i32 : i32, i32
  }
  func.func @transform_2(%arg0: i32, %arg1: i32) -> (i32, i32, i32) {
    %c0_i32 = arith.constant 0 : i32
    %c0_i32_0 = arith.constant 0 : i32
    %c0_i32_1 = arith.constant 0 : i32
    return %arg0, %c0_i32, %c0_i32_0 : i32, i32, i32
  }
}

</mosaic_0001>

<bundles_post_ra>
// kernel: _lambda_.3
= control target key start
LH: loop header
LB: loop body
LE: loop exit
PB: predicated region body
PF: predicated region fallthrough
CT: control target
= control target key end

     0   :  { %s834_s9 = smov 0   ;;  %s836_s10 = smov 0   ;;  %s1068_s0 = inlined_call_operand.vmem [shape: f32[160,128], index: 0, kind: input, shape index: {}]   ;;  %s1069_s1 = inlined_call_operand.vmem [shape: f32[128,256], index: 1, kind: input, shape index: {}]   ;;  %s1070_s2 = inlined_call_operand.vmem [shape: f32[2,8,128], index: 2, kind: output, shape index: {}]  }
   0x1   :  { %s838_s11 = smov 0  }
   0x2 LB: > { %s24_s12 = sadd.s32 1, %s812_s10  ;;  %p677_p0 = scmp.ge.s32.totalorder %s816_s11, 1  ;;  %s816_s11 = sphi %s838_s11, %s12_s11   ;;  %s812_s10 = sphi %s836_s10, %s1072_s10   ;;  %s808_s9 = sphi %s834_s9, %s1071_s9  }
   0x3   : > { %p26_p1 = scmp.ge.s32.totalorder %s24_s12, 2  ;;  %p105_p2 = scmp.lt.s32.totalorder %s816_s11, 3 }
   0x5   : > { %s1074_s12 = smov (%p26_p1, %s24_s12), 0  ;;  %p106_p3 = pnand %p677_p0, %p105_p2 }
   0x6   : > { %s126_s13 = smul.u32 (!%p106_p3), 10, %s808_s9  ;;  %p133_p4 = scmp.lt.s32.totalorder (!%p106_p3), %s808_s9, 1  ;;  %v173_v0 = vld [vmem:[%s1069_s1] sm:$0xff] (!%p106_p3)  ;;  %v175_v1 = vld [vmem:[%s1069_s1 + $0x8] sm:$0xff] (!%p106_p3)  ;;  %v177_v2 = vld [vmem:[%s1069_s1 + $0x10] sm:$0xff] (!%p106_p3) }
   0x7   : > { %109 = sbr.rel (%p106_p3) target bundleno = 525 (0x20d), region = 24  ;;  %v179_v3 = vld [vmem:[%s1069_s1 + $0x18] sm:$0xff] (!%p106_p3)  ;;  %v181_v4 = vld [vmem:[%s1069_s1 + $0x20] sm:$0xff] (!%p106_p3)  ;;  %v183_v5 = vld [vmem:[%s1069_s1 + $0x28] sm:$0xff] (!%p106_p3) }
   0x8   : > { %p127_p5 = scmp.lt.s32.totalorder (!%p106_p3), %s126_s13, 19  ;;  %v185_v6 = vld [vmem:[%s1069_s1 + $0x30] sm:$0xff] (!%p106_p3)  ;;  %v187_v7 = vld [vmem:[%s1069_s1 + $0x38] sm:$0xff] (!%p106_p3)  ;;  %v189_v8 = vld [vmem:[%s1069_s1 + $0x40] sm:$0xff] (!%p106_p3) }
   0x9   : > { %v191_v9 = vld [vmem:[%s1069_s1 + $0x48] sm:$0xff] (!%p106_p3)  ;;  %v193_v10 = vld [vmem:[%s1069_s1 + $0x50] sm:$0xff] (!%p106_p3)  ;;  %v195_v11 = vld [vmem:[%s1069_s1 + $0x58] sm:$0xff] (!%p106_p3) }
   0xa   : > { %v197_v12 = vld [vmem:[%s1069_s1 + $0x60] sm:$0xff] (!%p106_p3)  ;;  %v199_v13 = vld [vmem:[%s1069_s1 + $0x68] sm:$0xff] (!%p106_p3)  ;;  %v201_v14 = vld [vmem:[%s1069_s1 + $0x70] sm:$0xff] (!%p106_p3) }
   0xb   : > { %v203_v15 = vld [vmem:[%s1069_s1 + $0x78] sm:$0xff] (!%p106_p3)  ;;  %v205_v16 = vld [vmem:[%s1069_s1 + $0x80] sm:$0xff] (!%p106_p3)  ;;  %v207_v17 = vld [vmem:[%s1069_s1 + $0x88] sm:$0xff] (!%p106_p3) }
   0xc   : > { %v209_v18 = vld [vmem:[%s1069_s1 + $0x90] sm:$0xff] (!%p106_p3)  ;;  %v211_v19 = vld [vmem:[%s1069_s1 + $0x98] sm:$0xff] (!%p106_p3)  ;;  %v213_v20 = vld [vmem:[%s1069_s1 + $0xa0] sm:$0xff] (!%p106_p3) }
   0xd   : > { %v215_v21 = vld [vmem:[%s1069_s1 + $0xa8] sm:$0xff] (!%p106_p3)  ;;  %v217_v22 = vld [vmem:[%s1069_s1 + $0xb0] sm:$0xff] (!%p106_p3)  ;;  %v219_v23 = vld [vmem:[%s1069_s1 + $0xb8] sm:$0xff] (!%p106_p3) }
   0xe   : > { %s1076_s9 = smov (!%p133_p4, %s808_s9), 1  ;;  %s1078_s13 = smov (!%p127_p5, %s126_s13), 19  ;;  %v221_v24 = vld [vmem:[%s1069_s1 + $0xc0] sm:$0xff]  ;;  %v223_v25 = vld [vmem:[%s1069_s1 + $0xc8] sm:$0xff]  ;;  %v225_v26 = vld [vmem:[%s1069_s1 + $0xd0] sm:$0xff] }
   0xf   : > { %s679_s21 = sshll.u32 %s1076_s9, 3  ;;  %s678_s28 = sshll.u32 %s1078_s13, 3  ;;  %v227_v27 = vld [vmem:[%s1069_s1 + $0xd8] sm:$0xff]  ;;  %v229_v28 = vld [vmem:[%s1069_s1 + $0xe0] sm:$0xff]  ;;  %v231_v29 = vld [vmem:[%s1069_s1 + $0xe8] sm:$0xff] }
  0x10   : > { %s909_s3 = scalar_lea.vmem %s1070_s2, %s679_s21  ;;  %s923_s13 = scalar_lea.vmem %s1068_s0, %s678_s28  ;;  %v233_v30 = vld [vmem:[%s1069_s1 + $0xf0] sm:$0xff]  ;;  %v235_v31 = vld [vmem:[%s1069_s1 + $0xf8] sm:$0xff] }
  0x11   : > { %244 = vsyncadd [#allocation3], 4096  ;;  %v683_v32 = vpack.c.bf16 %v179_v3, %v175_v1  ;;  %v685_v33 = vpack.c.bf16 %v177_v2, %v173_v0  ;;  %v687_v34 = vpack.c.bf16 %v187_v7, %v183_v5 }
  0x12   : > { %804 = dma.done.wait [#allocation3], 4096 }
  0x13   : > { %805 = vsyncadd [#allocation3], 4294963200  ;;  %684 = vmatprep.subr.bf16.mxu0 %v683_v32  ;;  %715 = vmatprep.subr.bf16.mxu1 %v683_v32  ;;  %v689_v35 = vpack.c.bf16 %v185_v6, %v181_v4  ;;  %v691_v36 = vpack.c.bf16 %v195_v11, %v191_v9  ;;  %v818_v37 = vmov 0.0   ;;  %v693_v38 = vpack.c.bf16 %v193_v10, %v189_v8  ;;  %v250_v49 = vld [vmem:[%s923_s13] sm:$0xff]  ;;  %v255_v50 = vld [vmem:[%s923_s13 + $0x28] sm:$0xff] }
  0x14   : > { %686 = vmatpush1.bf16.msra.mxu0 %v685_v33  ;;  %723 = vmatpush1.bf16.msra.mxu1 %v685_v33  ;;  %v695_v39 = vpack.c.bf16 %v203_v15, %v199_v13  ;;  %v697_v40 = vpack.c.bf16 %v201_v14, %v197_v12  ;;  %v699_v41 = vpack.c.bf16 %v211_v19, %v207_v17  ;;  %v251_v51 = vld [vmem:[%s923_s13 + $0x8] sm:$0xff]  ;;  %v256_v52 = vld [vmem:[%s923_s13 + $0x30] sm:$0xff]  ;;  %v257_v54 = vld [vmem:[%s923_s13 + $0x38] sm:$0xff] }
  0x15   : > { %688 = vmatprep.subr.bf16.mxu0 %v687_v34  ;;  %716 = vmatprep.subr.bf16.mxu1 %v687_v34  ;;  %v701_v42 = vpack.c.bf16 %v209_v18, %v205_v16  ;;  %v703_v43 = vpack.c.bf16 %v219_v23, %v215_v21  ;;  %v705_v44 = vpack.c.bf16 %v217_v22, %v213_v20  ;;  %v252_v53 = vld [vmem:[%s923_s13 + $0x10] sm:$0xff]  ;;  %v253_v55 = vld [vmem:[%s923_s13 + $0x18] sm:$0xff]  ;;  %v258_v56 = vld [vmem:[%s923_s13 + $0x40] sm:$0xff] }
  0x16   : > { %356 = vmatprep.mubr.f32.mxu0 %v818_v37  ;;  %386 = vmatprep.mubr.f32.mxu1 %v818_v37  ;;  %v707_v45 = vpack.c.bf16 %v227_v27, %v223_v25  ;;  %v709_v46 = vpack.c.bf16 %v225_v26, %v221_v24  ;;  %v711_v47 = vpack.c.bf16 %v235_v31, %v231_v29  ;;  %v254_v57 = vld [vmem:[%s923_s13 + $0x20] sm:$0xff]  ;;  %v259_v58 = vld [vmem:[%s923_s13 + $0x48] sm:$0xff] }
  0x17   : > { %v713_v48 = vpack.c.bf16 %v233_v30, %v229_v28 }
  0x18   : > { %690 = vmatpush1.bf16.msra.mxu0 %v689_v35  ;;  %724 = vmatpush1.bf16.msra.mxu1 %v689_v35 }
  0x19   : > { %692 = vmatprep.subr.bf16.mxu0 %v691_v36  ;;  %717 = vmatprep.subr.bf16.mxu1 %v691_v36 }
  0x1c   : > { %694 = vmatpush1.bf16.msra.mxu0 %v693_v38  ;;  %725 = vmatpush1.bf16.msra.mxu1 %v693_v38 }
  0x1d   : > { %696 = vmatprep.subr.bf16.mxu0 %v695_v39  ;;  %718 = vmatprep.subr.bf16.mxu1 %v695_v39 }
  0x20   : > { %698 = vmatpush1.bf16.msra.mxu0 %v697_v40  ;;  %726 = vmatpush1.bf16.msra.mxu1 %v697_v40 }
  0x21   : > { %700 = vmatprep.subr.bf16.mxu0 %v699_v41  ;;  %719 = vmatprep.subr.bf16.mxu1 %v699_v41 }
  0x24   : > { %702 = vmatpush1.bf16.msra.mxu0 %v701_v42  ;;  %727 = vmatpush1.bf16.msra.mxu1 %v701_v42 }
  0x25   : > { %704 = vmatprep.subr.bf16.mxu0 %v703_v43  ;;  %720 = vmatprep.subr.bf16.mxu1 %v703_v43 }
  0x28   : > { %706 = vmatpush1.bf16.msra.mxu0 %v705_v44  ;;  %728 = vmatpush1.bf16.msra.mxu1 %v705_v44 }
  0x29   : > { %708 = vmatprep.subr.bf16.mxu0 %v707_v45  ;;  %721 = vmatprep.subr.bf16.mxu1 %v707_v45 }
  0x2c   : > { %710 = vmatpush1.bf16.msra.mxu0 %v709_v46  ;;  %729 = vmatpush1.bf16.msra.mxu1 %v709_v46 }
  0x2d   : > { %712 = vmatprep.subr.bf16.mxu0 %v711_v47  ;;  %722 = vmatprep.subr.bf16.mxu1 %v711_v47 }
  0x30   : > { %714 = vmatpush1.bf16.msra.mxu0 %v713_v48  ;;  %730 = vmatpush1.bf16.msra.mxu1 %v713_v48 }
  0x33   : > { %357 = vmatmul.mubr.f32.vlgmr.msra.gmra.mrb[0].mxu0 %v250_v49  ;;  %387 = vmatmul.mubr.f32.vlgmr.msra.gmra.mrb[0].mxu1 %v255_v50 }
  0x34   : > { %362 = vmatprep.mubr.f32.mxu0 %v818_v37  ;;  %392 = vmatprep.mubr.f32.mxu1 %v818_v37 }
  0x37   : > { %363 = vmatmul.mubr.f32.gmra.mrb[2].mxu0 %v251_v51  ;;  %393 = vmatmul.mubr.f32.gmra.mrb[2].mxu1 %v256_v52 }
  0x38   : > { %368 = vmatprep.mubr.f32.mxu0 %v818_v37  ;;  %398 = vmatprep.mubr.f32.mxu1 %v818_v37 }
  0x3b   : > { %369 = vmatmul.mubr.f32.gmra.mrb[4].mxu0 %v252_v53  ;;  %399 = vmatmul.mubr.f32.gmra.mrb[4].mxu1 %v257_v54 }
  0x3c   : > { %374 = vmatprep.mubr.f32.mxu0 %v818_v37  ;;  %404 = vmatprep.mubr.f32.mxu1 %v818_v37 }
  0x3f   : > { %375 = vmatmul.mubr.f32.gmra.mrb[6].mxu0 %v253_v55  ;;  %405 = vmatmul.mubr.f32.gmra.mrb[6].mxu1 %v258_v56 }
  0x40   : > { %380 = vmatprep.mubr.f32.mxu0 %v818_v37  ;;  %410 = vmatprep.mubr.f32.mxu1 %v818_v37 }
  0x43   : > { %381 = vmatmul.mubr.f32.gmra.mrb[8].mxu0 %v254_v57  ;;  %411 = vmatmul.mubr.f32.gmra.mrb[8].mxu1 %v259_v58 }
 0x106   : > { %v358_v59 = vpop.f32.mrb[0].mxu0  ;;  %v388_v60 = vpop.f32.mrb[0].mxu1 }
 0x107   : > { %v417_v61 = vmul.f32 %v358_v59, %v358_v59  ;;  %v437_v62 = vmul.f32 %v388_v60, %v388_v60  ;;  %v360_v63 = vpop.f32.mrb[1].mxu0  ;;  %v390_v0 = vpop.f32.mrb[1].mxu1 }
 0x108   : > { %v422_v1 = vmul.f32 %v360_v63, %v360_v63  ;;  %v442_v2 = vmul.f32 %v390_v0, %v390_v0 }
 0x10a   : > { %v427_v3 = vadd.f32 %v422_v1, %v417_v61  ;;  %v447_v4 = vadd.f32 %v442_v2, %v437_v62  ;;  %v364_v5 = vpop.f32.mrb[2].mxu0  ;;  %v394_v6 = vpop.f32.mrb[2].mxu1 }
 0x10b   : > { %v418_v7 = vmul.f32 %v364_v5, %v364_v5  ;;  %v438_v8 = vmul.f32 %v394_v6, %v394_v6  ;;  %v366_v9 = vpop.f32.mrb[3].mxu0  ;;  %v396_v10 = vpop.f32.mrb[3].mxu1 }
 0x10c   : > { %v432_v11 = vmax.f32 %v427_v3, 1e-08  ;;  %v968_v12 = vmax.f32 %v447_v4, 1e-08  ;;  %v423_v13 = vmul.f32 %v366_v9, %v366_v9  ;;  %v443_v14 = vmul.f32 %v396_v10, %v396_v10 }
 0x10e   : > { %762 = vlog2.f32 %v432_v11  ;;  %v971_v15 = vmul.f32 %v968_v12, %v432_v11  ;;  %v428_v16 = vadd.f32 %v423_v13, %v418_v7  ;;  %v448_v17 = vadd.f32 %v443_v14, %v438_v8  ;;  %v370_v18 = vpop.f32.mrb[4].mxu0  ;;  %v400_v19 = vpop.f32.mrb[4].mxu1 }
 0x10f   : > { %764 = vlog2.f32 %v968_v12  ;;  %v419_v20 = vmul.f32 %v370_v18, %v370_v18  ;;  %v439_v21 = vmul.f32 %v400_v19, %v400_v19  ;;  %v372_v22 = vpop.f32.mrb[5].mxu0  ;;  %v402_v23 = vpop.f32.mrb[5].mxu1  ;;  %v975_v24 = vadd.f32 %v968_v12, %v432_v11 }
 0x110   : > { %v433_v25 = vmax.f32 %v428_v16, 1e-08  ;;  %v977_v26 = vmax.f32 %v448_v17, 1e-08  ;;  %v424_v27 = vmul.f32 %v372_v22, %v372_v22  ;;  %v444_v28 = vmul.f32 %v402_v23, %v402_v23 }
 0x111   : > { %766 = vrsqrt.f32 %v971_v15  ;;  %vm464_vm0 = vcmp.eq.f32.partialorder %v971_v15, inf  ;;  %vm466_vm1 = vcmp.eq.f32.partialorder %v971_v15, 0.0  ;;  %v467_v9 = vand.u32 2147483648, %v971_v15 }
 0x112   : > { %768 = vlog2.f32 %v433_v25  ;;  %v981_v29 = vmul.f32 %v977_v26, %v433_v25  ;;  %v429_v30 = vadd.f32 %v424_v27, %v419_v20  ;;  %v449_v31 = vadd.f32 %v444_v28, %v439_v21  ;;  %v376_v32 = vpop.f32.mrb[6].mxu0  ;;  %v406_v33 = vpop.f32.mrb[6].mxu1 }
 0x113   : > { %770 = vlog2.f32 %v977_v26  ;;  %v420_v34 = vmul.f32 %v376_v32, %v376_v32  ;;  %v440_v35 = vmul.f32 %v406_v33, %v406_v33  ;;  %v378_v36 = vpop.f32.mrb[7].mxu0  ;;  %v408_v37 = vpop.f32.mrb[7].mxu1  ;;  %v985_v38 = vadd.f32 %v977_v26, %v433_v25 }
 0x114   : > { %v434_v39 = vmax.f32 %v429_v30, 1e-08  ;;  %v987_v40 = vmax.f32 %v449_v31, 1e-08  ;;  %v425_v41 = vmul.f32 %v378_v36, %v378_v36  ;;  %v445_v42 = vmul.f32 %v408_v37, %v408_v37 }
 0x115   : > { %772 = vrsqrt.f32 %v981_v29  ;;  %vm471_vm2 = vcmp.eq.f32.partialorder %v981_v29, inf  ;;  %vm473_vm3 = vcmp.eq.f32.partialorder %v981_v29, 0.0  ;;  %v474_v20 = vand.u32 2147483648, %v981_v29 }
 0x116   : > { %774 = vlog2.f32 %v434_v39  ;;  %v991_v43 = vmul.f32 %v987_v40, %v434_v39  ;;  %v430_v44 = vadd.f32 %v425_v41, %v420_v34  ;;  %v450_v45 = vadd.f32 %v445_v42, %v440_v35  ;;  %v382_v46 = vpop.f32.mrb[8].mxu0  ;;  %v412_v47 = vpop.f32.mrb[8].mxu1 }
 0x117   : > { %776 = vlog2.f32 %v987_v40  ;;  %v421_v48 = vmul.f32 %v382_v46, %v382_v46  ;;  %v441_v49 = vmul.f32 %v412_v47, %v412_v47  ;;  %v384_v50 = vpop.f32.mrb[9].mxu0  ;;  %v414_v51 = vpop.f32.mrb[9].mxu1  ;;  %v995_v52 = vadd.f32 %v987_v40, %v434_v39 }
 0x118   : > { %v763_v53 = vpop.eup %762  ;;  %v435_v54 = vmax.f32 %v430_v44, 1e-08  ;;  %v997_v55 = vmax.f32 %v450_v45, 1e-08  ;;  %v426_v56 = vmul.f32 %v384_v50, %v384_v50  ;;  %v446_v57 = vmul.f32 %v414_v51, %v414_v51 }
 0x119   : > { %v765_v58 = vpop.eup %764  ;;  %v539_v59 = vmul.f32 0.6931472, %v763_v53  ;;  %778 = vrsqrt.f32 %v991_v43  ;;  %vm478_vm4 = vcmp.eq.f32.partialorder %v991_v43, inf  ;;  %vm480_vm5 = vcmp.eq.f32.partialorder %v991_v43, 0.0 }
 0x11a   : > { %780 = vlog2.f32 %v435_v54  ;;  %v1001_v60 = vmul.f32 %v997_v55, %v435_v54  ;;  %v431_v61 = vadd.f32 %v426_v56, %v421_v48  ;;  %v451_v62 = vadd.f32 %v446_v57, %v441_v49 }
 0x11b   : > { %v767_v63 = vpop.eup %766  ;;  %v549_v0 = vmul.f32 0.6931472, %v765_v58  ;;  %782 = vlog2.f32 %v997_v55  ;;  %v1006_v1 = vadd.f32 %v997_v55, %v435_v54  ;;  %v481_v33 = vand.u32 2147483648, %v991_v43 }
 0x11c   : > { %v769_v2 = vpop.eup %768  ;;  %v436_v3 = vmax.f32 %v431_v61, 1e-08  ;;  %v1008_v4 = vmax.f32 %v451_v62, 1e-08  ;;  %v463_v5 = vmul.f32 %v767_v63, %v971_v15  ;;  %784 = vrsqrt.f32 %v1001_v60 }
 0x11d   : > { %v771_v6 = vpop.eup %770  ;;  %v541_v7 = vmul.f32 0.6931472, %v769_v2  ;;  %v558_v8 = vsub.f32 %v539_v59, %v549_v0  ;;  %v525_v34 = vadd.f32 %v977_v26, %v968_v12  ;;  %vm485_vm6 = vcmp.eq.f32.partialorder %v1001_v60, inf }
 0x11e   : > { %786 = vlog2.f32 %v436_v3  ;;  %v1015_v10 = vmul.f32 %v1008_v4, %v436_v3  ;;  %v551_v11 = vmul.f32 0.6931472, %v771_v6  ;;  %v465_v13 = vsel %vm464_vm0, %v971_v15, %v463_v5 }
 0x11f   : > { %v773_v14 = vpop.eup %772  ;;  %788 = vlog2.f32 %v1008_v4  ;;  %v468_v16 = vsel %vm466_vm1, %v467_v9, %v465_v13  ;;  %v563_v23 = vand.u32 2147483647, %v558_v8  ;;  %v501_v15 = vadd.f32 %v1008_v4, %v436_v3 }
 0x120   : > { %v775_v17 = vpop.eup %774  ;;  %v559_v18 = vsub.f32 %v541_v7, %v551_v11  ;;  %v470_v19 = vmul.f32 %v773_v14, %v981_v29  ;;  %790 = vrsqrt.f32 %v1015_v10  ;;  %v502_v30 = vmul.f32 2.0, %v468_v16 }
 0x121   : > { %v777_v21 = vpop.eup %776  ;;  %v543_v22 = vmul.f32 0.6931472, %v775_v17  ;;  %v526_v45 = vadd.f32 %v525_v34, %v987_v40  ;;  %v488_v51 = vand.u32 2147483648, %v1001_v60  ;;  %vm487_vm7 = vcmp.eq.f32.partialorder %v1001_v60, 0.0 }
 0x122   : > { %v553_v25 = vmul.f32 0.6931472, %v777_v21  ;;  %v564_v27 = vand.u32 2147483647, %v559_v18  ;;  %v472_v28 = vsel %vm471_vm2, %v981_v29, %v470_v19  ;;  %v507_v29 = vsub.f32 %v975_v24, %v502_v30 }
 0x123   : > { %v779_v31 = vpop.eup %778  ;;  %v475_v32 = vsel %vm473_vm3, %v474_v20, %v472_v28  ;;  %v527_v24 = vadd.f32 %v526_v45, %v997_v55  ;;  %vm492_vm8 = vcmp.eq.f32.partialorder %v1015_v10, inf  ;;  %v495_v7 = vand.u32 2147483648, %v1015_v10 }
 0x124   : > { %v781_v35 = vpop.eup %780  ;;  %v560_v36 = vsub.f32 %v543_v22, %v553_v25  ;;  %v568_v37 = vadd.f32 %v564_v27, %v563_v23  ;;  %v477_v39 = vmul.f32 %v779_v31, %v991_v43  ;;  %v503_v41 = vmul.f32 2.0, %v475_v32 }
 0x125   : > { %v783_v42 = vpop.eup %782  ;;  %v545_v44 = vmul.f32 0.6931472, %v781_v35  ;;  %vm494_vm9 = vcmp.eq.f32.partialorder %v1015_v10, 0.0 }
 0x126   : > { %v785_v46 = vpop.eup %784  ;;  %v555_v47 = vmul.f32 0.6931472, %v783_v42  ;;  %v565_v48 = vand.u32 2147483647, %v560_v36  ;;  %v479_v12 = vsel %vm478_vm4, %v991_v43, %v477_v39  ;;  %v508_v26 = vsub.f32 %v985_v38, %v503_v41 }
 0x127   : > { %v482_v49 = vsel %vm480_vm5, %v481_v33, %v479_v12  ;;  %v484_v50 = vmul.f32 %v785_v46, %v1001_v60  ;;  %v528_v43 = vadd.f32 %v527_v24, %v1008_v4  ;;  %v582_v41 = vlaneseq }
 0x128   : > { %v787_v53 = vpop.eup %786  ;;  %v561_v40 = vsub.f32 %v545_v44, %v555_v47  ;;  %v569_v54 = vadd.f32 %v568_v37, %v565_v48  ;;  %v504_v56 = vmul.f32 2.0, %v482_v49  ;;  %v512_v57 = vadd.f32 %v508_v26, %v507_v29 }
 0x129   : > { %v789_v58 = vpop.eup %788  ;;  %v547_v59 = vmul.f32 0.6931472, %v787_v53  ;;  %v486_v38 = vsel %vm485_vm6, %v1001_v60, %v484_v50  ;;  %v583_v42 = vshrl.u32 %v582_v41, 7 }
 0x12a   : > { %v791_v61 = vpop.eup %790  ;;  %v557_v62 = vmul.f32 0.6931472, %v789_v58  ;;  %v566_v63 = vand.u32 2147483647, %v561_v40  ;;  %v489_v0 = vsel %vm487_vm7, %v488_v51, %v486_v38  ;;  %v509_v55 = vsub.f32 %v995_v52, %v504_v56 }
 0x12b   : > { %v491_v2 = vmul.f32 %v791_v61, %v1015_v10  ;;  %v505_v3 = vmul.f32 2.0, %v489_v0  ;;  %vm584_vm10 = vcmp.eq.s32.totalorder %v583_v42, 0  ;;  %vm587_vm11 = vcmp.eq.s32.totalorder %v583_v42, 1 }
 0x12c   : > { %v562_v5 = vsub.f32 %v547_v59, %v557_v62  ;;  %v570_v6 = vadd.f32 %v569_v54, %v566_v63  ;;  %v513_v8 = vadd.f32 %v512_v57, %v509_v55  ;;  %vm591_vm12 = vcmp.eq.s32.totalorder %v583_v42, 2 }
 0x12d   : > { %v493_v60 = vsel %vm492_vm8, %v1015_v10, %v491_v2  ;;  %v510_v4 = vsub.f32 %v1006_v1, %v505_v3 }
 0x12e   : > { %v567_v9 = vand.u32 2147483647, %v562_v5  ;;  %v496_v11 = vsel %vm494_vm9, %v495_v7, %v493_v60 }
 0x12f   : > { %v506_v13 = vmul.f32 2.0, %v496_v11  ;;  %v514_v52 = vadd.f32 %v513_v8, %v510_v4 }
 0x130   : > { %v571_v14 = vadd.f32 %v570_v6, %v567_v9 }
 0x131   : > { %v511_v16 = vsub.f32 %v501_v15, %v506_v13 }
 0x132   : > { %572 = vadd.xlane.f32.xlu1 %v571_v14 }
 0x133   : > { %v515_v17 = vadd.f32 %v514_v52, %v511_v16 }
 0x135   : > { %516 = vadd.xlane.f32.xlu0 %v515_v17 }
 0x139   : > { %529 = vadd.xlane.f32.xlu0 %v528_v43 }
 0x1bf   : > { %v573_v18 = vpop.xlane.xlu1 %572 }
 0x1c0   : > { %v574_v19 = vrot.slane %v573_v18, 4 }
 0x1c2   : > { %v575_v20 = vadd.f32 %v574_v19, %v573_v18  ;;  %v517_v21 = vpop.xlane.xlu0 %516 }
 0x1c3   : > { %v518_v22 = vrot.slane %v517_v21, 4 }
 0x1c4   : > { %v576_v25 = vrot.slane %v575_v20, 2 }
 0x1c5   : > { %v519_v23 = vadd.f32 %v518_v22, %v517_v21 }
 0x1c6   : > { %v530_v10 = vpop.xlane.xlu0 %529  ;;  %v577_v31 = vadd.f32 %v576_v25, %v575_v20 }
 0x1c7   : > { %v520_v27 = vrot.slane %v519_v23, 2  ;;  %v531_v1 = vrot.slane %v530_v10, 4 }
 0x1c8   : > { %v578_v35 = vrot.slane %v577_v31, 1 }
 0x1c9   : > { %v532_v28 = vadd.f32 %v531_v1, %v530_v10  ;;  %v521_v30 = vadd.f32 %v520_v27, %v519_v23 }
 0x1ca   : > { %v579_v39 = vadd.f32 %v578_v35, %v577_v31 }
 0x1cb   : > { %v533_v32 = vrot.slane %v532_v28, 2  ;;  %v522_v33 = vrot.slane %v521_v30, 1 }
 0x1cd   : > { %v534_v15 = vadd.f32 %v533_v32, %v532_v28  ;;  %v523_v34 = vadd.f32 %v522_v33, %v521_v30 }
 0x1cf   : > { %731 = vpush %v523_v34  ;;  %v535_v36 = vrot.slane %v534_v15, 1 }
 0x1d1   : > { %v536_v37 = vadd.f32 %v535_v36, %v534_v15 }
 0x1d3   : > { %733 = vpush %v536_v37 }
 0x1d4   : > { %735 = vpush %v579_v39 }
 0x200   : > { %s732_s15 = spop %731 }
 0x201   : > { %v585_v44 = vstv %s732_s15 }
 0x202   : > { %v586_v45 = vsel %vm584_vm10, %v585_v44, 0.0 }
 0x204   : > { %s734_s13 = spop %733 }
 0x205   : > { %v588_v29 = vstv %s734_s13  ;;  %s736_s16 = spop %735 }
 0x206   : > { %v589_v46 = vsel %vm587_vm11, %v588_v29, 0.0  ;;  %s581_s17 = smul.f32 0.5, %s736_s16 }
 0x207   : > { %v590_v47 = vadd.f32 %v589_v46, %v586_v45 }
 0x208   : > { %v592_v48 = vstv %s581_s17 }
 0x209   : > { %v593_v12 = vsel %vm591_vm12, %v592_v48, 0.0 }
 0x20a   : > { %v594_v26 = vadd.f32 %v593_v12, %v590_v47 }
 0x20c   : > { %597 = vst [vmem:[%s909_s3] sm:$0xff] %v594_v26 }
 0x20d PF: > { %s12_s11 = sadd.s32 1, %s816_s11   ;;  %s1071_s9 = smov %s812_s10 }
 0x20e   : > { %p9_p6 = scmp.ge.s32.totalorder %s12_s11, 4   ;;  %s1072_s10 = smov %s1074_s12 }
 0x210   :  { %11 = sbr.rel (!%p9_p6) target bundleno = 2 (0x2), region = 100 }
 0x217   :  { %617 = vsyncmov [#allocation3] }
 0x21a   :  { %s618_s18 = vpop.sfrf %617 }
 0x21b   :  { %p682_p7 = scmp.ne.s32.totalorder %s618_s18, 0 }
 0x21d   :  { %622 = shalt.err (%p682_p7)  }

// kernel: _lambda_.5
= control target key start
LH: loop header
LB: loop body
LE: loop exit
PB: predicated region body
PF: predicated region fallthrough
CT: control target
= control target key end

     0   :  { %s1027_s9 = smov 0   ;;  %s1029_s10 = smov 0   ;;  %s1372_s0 = inlined_call_operand.vmem [shape: f32[288,64], index: 0, kind: input, shape index: {}]   ;;  %s1373_s1 = inlined_call_operand.vmem [shape: f32[64,256], index: 1, kind: input, shape index: {}]   ;;  %s1374_s2 = inlined_call_operand.vmem [shape: f32[2,8,128], index: 2, kind: output, shape index: {}]  }
   0x1   :  { %s1031_s11 = smov 0  }
   0x2 LB: > { %s24_s12 = sadd.s32 1, %s1005_s10  ;;  %p852_p0 = scmp.ge.s32.totalorder %s1009_s11, 1  ;;  %s1009_s11 = sphi %s1031_s11, %s12_s11   ;;  %s1005_s10 = sphi %s1029_s10, %s1376_s10   ;;  %s1001_s9 = sphi %s1027_s9, %s1375_s9  }
   0x3   : > { %p26_p1 = scmp.ge.s32.totalorder %s24_s12, 2  ;;  %p105_p2 = scmp.lt.s32.totalorder %s1009_s11, 3 }
   0x5   : > { %s1378_s12 = smov (%p26_p1, %s24_s12), 0  ;;  %p106_p3 = pnand %p852_p0, %p105_p2 }
   0x6   : > { %s126_s13 = smul.u32 (!%p106_p3), 18, %s1001_s9  ;;  %p133_p4 = scmp.lt.s32.totalorder (!%p106_p3), %s1001_s9, 1  ;;  %v173_v0 = vld [vmem:[%s1373_s1] sm:$0xff] (!%p106_p3)  ;;  %v175_v1 = vld [vmem:[%s1373_s1 + $0x8] sm:$0xff] (!%p106_p3)  ;;  %v177_v2 = vld [vmem:[%s1373_s1 + $0x10] sm:$0xff] (!%p106_p3) }
   0x7   : > { %109 = sbr.rel (%p106_p3) target bundleno = 536 (0x218), region = 24  ;;  %v179_v3 = vld [vmem:[%s1373_s1 + $0x18] sm:$0xff] (!%p106_p3)  ;;  %v181_v4 = vld [vmem:[%s1373_s1 + $0x20] sm:$0xff] (!%p106_p3)  ;;  %v183_v5 = vld [vmem:[%s1373_s1 + $0x28] sm:$0xff] (!%p106_p3) }
   0x8   : > { %p127_p5 = scmp.lt.s32.totalorder (!%p106_p3), %s126_s13, 35  ;;  %v185_v6 = vld [vmem:[%s1373_s1 + $0x30] sm:$0xff] (!%p106_p3)  ;;  %v187_v7 = vld [vmem:[%s1373_s1 + $0x38] sm:$0xff] (!%p106_p3)  ;;  %v189_v8 = vld [vmem:[%s1373_s1 + $0x40] sm:$0xff] (!%p106_p3) }
   0x9   : > { %v191_v9 = vld [vmem:[%s1373_s1 + $0x48] sm:$0xff] (!%p106_p3)  ;;  %v193_v10 = vld [vmem:[%s1373_s1 + $0x50] sm:$0xff] (!%p106_p3)  ;;  %v195_v11 = vld [vmem:[%s1373_s1 + $0x58] sm:$0xff] (!%p106_p3) }
   0xa   : > { %v197_v12 = vld [vmem:[%s1373_s1 + $0x60] sm:$0xff] (!%p106_p3)  ;;  %v199_v13 = vld [vmem:[%s1373_s1 + $0x68] sm:$0xff] (!%p106_p3)  ;;  %v201_v14 = vld [vmem:[%s1373_s1 + $0x70] sm:$0xff] (!%p106_p3) }
   0xb   : > { %v203_v15 = vld [vmem:[%s1373_s1 + $0x78] sm:$0xff] (!%p106_p3) }
   0xe   : > { %s1380_s9 = smov (!%p133_p4, %s1001_s9), 1  ;;  %s1382_s13 = smov (!%p127_p5, %s126_s13), 35 }
   0xf   : > { %s854_s21 = sshll.u32 %s1380_s9, 3  ;;  %s853_s24 = sshll.u32 %s1382_s13, 3 }
  0x10   : > { %s1096_s27 = scalar_lea.vmem %s1374_s2, %s854_s21  ;;  %s1101_s30 = scalar_lea.vmem %s1372_s0, %s853_s24 }
  0x11   : > { %212 = vsyncadd [#allocation3], 2048  ;;  %v876_v16 = vpack.c.bf16 %v179_v3, %v175_v1  ;;  %v878_v17 = vpack.c.bf16 %v177_v2, %v173_v0  ;;  %v880_v18 = vpack.c.bf16 %v187_v7, %v183_v5 }
  0x12   : > { %997 = dma.done.wait [#allocation3], 2048 }
  0x13   : > { %998 = vsyncadd [#allocation3], 4294965248  ;;  %877 = vmatprep.subr.bf16.mxu0 %v876_v16  ;;  %892 = vmatprep.subr.bf16.mxu1 %v876_v16  ;;  %v882_v19 = vpack.c.bf16 %v185_v6, %v181_v4  ;;  %v884_v20 = vpack.c.bf16 %v195_v11, %v191_v9  ;;  %v1011_v21 = vmov 0.0   ;;  %v886_v22 = vpack.c.bf16 %v193_v10, %v189_v8  ;;  %v218_v25 = vld [vmem:[%s1101_s30] sm:$0xff]  ;;  %v227_v26 = vld [vmem:[%s1101_s30 + $0x48] sm:$0xff] }
  0x14   : > { %879 = vmatpush1.bf16.msra.mxu0 %v878_v17  ;;  %896 = vmatpush1.bf16.msra.mxu1 %v878_v17  ;;  %v888_v23 = vpack.c.bf16 %v203_v15, %v199_v13  ;;  %v890_v24 = vpack.c.bf16 %v201_v14, %v197_v12  ;;  %vm252_vm0 = vcmask 523264   ;;  %v219_v27 = vld [vmem:[%s1101_s30 + $0x8] sm:$0xff]  ;;  %v228_v28 = vld [vmem:[%s1101_s30 + $0x50] sm:$0xff]  ;;  %v229_v30 = vld [vmem:[%s1101_s30 + $0x58] sm:$0xff] }
  0x15   : > { %881 = vmatprep.subr.bf16.mxu0 %v880_v18  ;;  %893 = vmatprep.subr.bf16.mxu1 %v880_v18  ;;  %v220_v29 = vld [vmem:[%s1101_s30 + $0x10] sm:$0xff]  ;;  %v221_v31 = vld [vmem:[%s1101_s30 + $0x18] sm:$0xff]  ;;  %v230_v32 = vld [vmem:[%s1101_s30 + $0x60] sm:$0xff] }
  0x16   : > { %371 = vmatprep.mubr.f32.mxu0 %v1011_v21  ;;  %425 = vmatprep.mubr.f32.mxu1 %v1011_v21  ;;  %v222_v33 = vld [vmem:[%s1101_s30 + $0x20] sm:$0xff]  ;;  %v231_v34 = vld [vmem:[%s1101_s30 + $0x68] sm:$0xff]  ;;  %v232_v36 = vld [vmem:[%s1101_s30 + $0x70] sm:$0xff] }
  0x17   : > { %v223_v35 = vld [vmem:[%s1101_s30 + $0x28] sm:$0xff]  ;;  %v224_v37 = vld [vmem:[%s1101_s30 + $0x30] sm:$0xff]  ;;  %v233_v38 = vld [vmem:[%s1101_s30 + $0x78] sm:$0xff] }
  0x18   : > { %883 = vmatpush1.bf16.msra.mxu0 %v882_v19  ;;  %897 = vmatpush1.bf16.msra.mxu1 %v882_v19  ;;  %v225_v39 = vld [vmem:[%s1101_s30 + $0x38] sm:$0xff]  ;;  %v234_v40 = vld [vmem:[%s1101_s30 + $0x80] sm:$0xff]  ;;  %v235_v42 = vld [vmem:[%s1101_s30 + $0x88] sm:$0xff] }
  0x19   : > { %885 = vmatprep.subr.bf16.mxu0 %v884_v20  ;;  %894 = vmatprep.subr.bf16.mxu1 %v884_v20  ;;  %v226_v41 = vld [vmem:[%s1101_s30 + $0x40] sm:$0xff] }
  0x1c   : > { %887 = vmatpush1.bf16.msra.mxu0 %v886_v22  ;;  %898 = vmatpush1.bf16.msra.mxu1 %v886_v22 }
  0x1d   : > { %889 = vmatprep.subr.bf16.mxu0 %v888_v23  ;;  %895 = vmatprep.subr.bf16.mxu1 %v888_v23 }
  0x20   : > { %891 = vmatpush1.bf16.msra.mxu0 %v890_v24  ;;  %899 = vmatpush1.bf16.msra.mxu1 %v890_v24 }
  0x23   : > { %855 = vmatmul.mubr.msk.f32.vlgmr.msra.gmra.mrb[0].mxu0 %vm252_vm0, %v218_v25  ;;  %864 = vmatmul.mubr.msk.f32.vlgmr.msra.gmra.mrb[0].mxu1 %vm252_vm0, %v227_v26 }
  0x24   : > { %377 = vmatprep.mubr.f32.mxu0 %v1011_v21  ;;  %431 = vmatprep.mubr.f32.mxu1 %v1011_v21 }
  0x27   : > { %856 = vmatmul.mubr.msk.f32.gmra.mrb[2].mxu0 %vm252_vm0, %v219_v27  ;;  %865 = vmatmul.mubr.msk.f32.gmra.mrb[2].mxu1 %vm252_vm0, %v228_v28 }
  0x28   : > { %383 = vmatprep.mubr.f32.mxu0 %v1011_v21  ;;  %437 = vmatprep.mubr.f32.mxu1 %v1011_v21 }
  0x2b   : > { %857 = vmatmul.mubr.msk.f32.gmra.mrb[4].mxu0 %vm252_vm0, %v220_v29  ;;  %866 = vmatmul.mubr.msk.f32.gmra.mrb[4].mxu1 %vm252_vm0, %v229_v30 }
  0x2c   : > { %389 = vmatprep.mubr.f32.mxu0 %v1011_v21  ;;  %443 = vmatprep.mubr.f32.mxu1 %v1011_v21 }
  0x2f   : > { %858 = vmatmul.mubr.msk.f32.gmra.mrb[6].mxu0 %vm252_vm0, %v221_v31  ;;  %867 = vmatmul.mubr.msk.f32.gmra.mrb[6].mxu1 %vm252_vm0, %v230_v32 }
  0x30   : > { %395 = vmatprep.mubr.f32.mxu0 %v1011_v21  ;;  %449 = vmatprep.mubr.f32.mxu1 %v1011_v21 }
  0x33   : > { %859 = vmatmul.mubr.msk.f32.gmra.mrb[8].mxu0 %vm252_vm0, %v222_v33  ;;  %868 = vmatmul.mubr.msk.f32.gmra.mrb[8].mxu1 %vm252_vm0, %v231_v34 }
  0x34   : > { %401 = vmatprep.mubr.f32.mxu0 %v1011_v21  ;;  %455 = vmatprep.mubr.f32.mxu1 %v1011_v21 }
  0x37   : > { %860 = vmatmul.mubr.msk.f32.gmra.mrb[10].mxu0 %vm252_vm0, %v223_v35  ;;  %869 = vmatmul.mubr.msk.f32.gmra.mrb[10].mxu1 %vm252_vm0, %v232_v36 }
  0x38   : > { %407 = vmatprep.mubr.f32.mxu0 %v1011_v21  ;;  %461 = vmatprep.mubr.f32.mxu1 %v1011_v21 }
  0x3b   : > { %861 = vmatmul.mubr.msk.f32.gmra.mrb[12].mxu0 %vm252_vm0, %v224_v37  ;;  %870 = vmatmul.mubr.msk.f32.gmra.mrb[12].mxu1 %vm252_vm0, %v233_v38 }
  0x3c   : > { %413 = vmatprep.mubr.f32.mxu0 %v1011_v21  ;;  %467 = vmatprep.mubr.f32.mxu1 %v1011_v21 }
  0x3f   : > { %862 = vmatmul.mubr.msk.f32.gmra.mrb[14].mxu0 %vm252_vm0, %v225_v39  ;;  %871 = vmatmul.mubr.msk.f32.gmra.mrb[14].mxu1 %vm252_vm0, %v234_v40 }
  0x40   : > { %419 = vmatprep.mubr.f32.mxu0 %v1011_v21  ;;  %473 = vmatprep.mubr.f32.mxu1 %v1011_v21 }
  0x43   : > { %863 = vmatmul.mubr.msk.f32.gmra.mrb[16].mxu0 %vm252_vm0, %v226_v41  ;;  %872 = vmatmul.mubr.msk.f32.gmra.mrb[16].mxu1 %vm252_vm0, %v235_v42 }
  0xf6   : > { %v373_v43 = vpop.f32.mrb[0].mxu0  ;;  %v427_v44 = vpop.f32.mrb[0].mxu1 }
  0xf7   : > { %v480_v45 = vmul.f32 %v373_v43, %v373_v43  ;;  %v516_v46 = vmul.f32 %v427_v44, %v427_v44  ;;  %v375_v47 = vpop.f32.mrb[1].mxu0  ;;  %v429_v48 = vpop.f32.mrb[1].mxu1 }
  0xf8   : > { %v489_v49 = vmul.f32 %v375_v47, %v375_v47  ;;  %v525_v50 = vmul.f32 %v429_v48, %v429_v48 }
  0xfa   : > { %v498_v51 = vadd.f32 %v489_v49, %v480_v45  ;;  %v534_v52 = vadd.f32 %v525_v50, %v516_v46  ;;  %v379_v53 = vpop.f32.mrb[2].mxu0  ;;  %v433_v54 = vpop.f32.mrb[2].mxu1 }
  0xfb   : > { %v481_v55 = vmul.f32 %v379_v53, %v379_v53  ;;  %v517_v56 = vmul.f32 %v433_v54, %v433_v54  ;;  %v381_v57 = vpop.f32.mrb[3].mxu0  ;;  %v435_v58 = vpop.f32.mrb[3].mxu1 }
  0xfc   : > { %v507_v59 = vmax.f32 %v498_v51, 1e-08  ;;  %v543_v60 = vmax.f32 %v534_v52, 1e-08  ;;  %v490_v61 = vmul.f32 %v381_v57, %v381_v57  ;;  %v526_v62 = vmul.f32 %v435_v58, %v435_v58 }
  0xfe   : > { %931 = vlog2.f32 %v507_v59  ;;  %v1157_v63 = vmul.f32 %v543_v60, %v507_v59  ;;  %v1159_v0 = vadd.f32 %v543_v60, %v507_v59  ;;  %v499_v1 = vadd.f32 %v490_v61, %v481_v55  ;;  %v385_v2 = vpop.f32.mrb[4].mxu0  ;;  %v439_v3 = vpop.f32.mrb[4].mxu1 }
  0xff   : > { %933 = vlog2.f32 %v543_v60  ;;  %v535_v4 = vadd.f32 %v526_v62, %v517_v56  ;;  %v387_v5 = vpop.f32.mrb[5].mxu0  ;;  %v441_v6 = vpop.f32.mrb[5].mxu1  ;;  %v482_v7 = vmul.f32 %v385_v2, %v385_v2  ;;  %v518_v8 = vmul.f32 %v439_v3, %v439_v3 }
 0x100   : > { %935 = vrsqrt.f32 %v1157_v63  ;;  %v508_v9 = vmax.f32 %v499_v1, 1e-08  ;;  %v491_v11 = vmul.f32 %v387_v5, %v387_v5  ;;  %v527_v12 = vmul.f32 %v441_v6, %v441_v6 }
 0x101   : > { %v544_v10 = vmax.f32 %v535_v4, 1e-08  ;;  %vm563_vm1 = vcmp.eq.f32.partialorder %v1157_v63, inf  ;;  %vm565_vm2 = vcmp.eq.f32.partialorder %v1157_v63, 0.0  ;;  %v566_v29 = vand.u32 2147483648, %v1157_v63 }
 0x102   : > { %v391_v13 = vpop.f32.mrb[6].mxu0  ;;  %v445_v14 = vpop.f32.mrb[6].mxu1  ;;  %937 = vlog2.f32 %v508_v9  ;;  %v500_v20 = vadd.f32 %v491_v11, %v482_v7  ;;  %v536_v21 = vadd.f32 %v527_v12, %v518_v8 }
 0x103   : > { %v1162_v15 = vmul.f32 %v544_v10, %v508_v9  ;;  %v1164_v16 = vadd.f32 %v544_v10, %v508_v9  ;;  %v668_v17 = vadd.f32 %v544_v10, %v543_v60  ;;  %v393_v18 = vpop.f32.mrb[7].mxu0  ;;  %v447_v19 = vpop.f32.mrb[7].mxu1  ;;  %939 = vlog2.f32 %v544_v10 }
 0x104   : > { %v483_v22 = vmul.f32 %v391_v13, %v391_v13  ;;  %v509_v23 = vmax.f32 %v500_v20, 1e-08  ;;  %v545_v24 = vmax.f32 %v536_v21, 1e-08  ;;  %v519_v25 = vmul.f32 %v445_v14, %v445_v14 }
 0x105   : > { %941 = vrsqrt.f32 %v1162_v15  ;;  %v492_v26 = vmul.f32 %v393_v18, %v393_v18  ;;  %v573_v30 = vand.u32 2147483648, %v1162_v15  ;;  %v528_v31 = vmul.f32 %v447_v19, %v447_v19 }
 0x106   : > { %v397_v27 = vpop.f32.mrb[8].mxu0  ;;  %v451_v28 = vpop.f32.mrb[8].mxu1  ;;  %943 = vlog2.f32 %v509_v23  ;;  %v1171_v35 = vmul.f32 %v545_v24, %v509_v23  ;;  %v1173_v36 = vadd.f32 %v545_v24, %v509_v23  ;;  %v669_v37 = vadd.f32 %v668_v17, %v545_v24 }
 0x107   : > { %v399_v32 = vpop.f32.mrb[9].mxu0  ;;  %v453_v33 = vpop.f32.mrb[9].mxu1  ;;  %vm570_vm3 = vcmp.eq.f32.partialorder %v1162_v15, inf  ;;  %945 = vlog2.f32 %v545_v24  ;;  %v501_v40 = vadd.f32 %v492_v26, %v483_v22  ;;  %v537_v41 = vadd.f32 %v528_v31, %v519_v25 }
 0x108   : > { %v932_v34 = vpop.eup %931  ;;  %vm572_vm4 = vcmp.eq.f32.partialorder %v1162_v15, 0.0  ;;  %947 = vrsqrt.f32 %v1171_v35  ;;  %v484_v44 = vmul.f32 %v397_v27, %v397_v27  ;;  %v520_v45 = vmul.f32 %v451_v28, %v451_v28 }
 0x109   : > { %v934_v38 = vpop.eup %933  ;;  %v1175_v39 = vmul.f32 0.6931472, %v932_v34  ;;  %v580_v49 = vand.u32 2147483648, %v1171_v35  ;;  %v510_v50 = vmax.f32 %v501_v40, 1e-08  ;;  %v493_v54 = vmul.f32 %v399_v32, %v399_v32 }
 0x10a   : > { %v936_v42 = vpop.eup %935  ;;  %v1178_v43 = vmul.f32 0.6931472, %v934_v38  ;;  %v403_v46 = vpop.f32.mrb[10].mxu0  ;;  %v546_v51 = vmax.f32 %v537_v41, 1e-08  ;;  %v529_v55 = vmul.f32 %v453_v33, %v453_v33  ;;  %vm577_vm5 = vcmp.eq.f32.partialorder %v1171_v35, inf }
 0x10b   : > { %v457_v47 = vpop.f32.mrb[10].mxu1  ;;  %v562_v48 = vmul.f32 %v936_v42, %v1157_v63  ;;  %v405_v52 = vpop.f32.mrb[11].mxu0  ;;  %v485_v56 = vmul.f32 %v403_v46, %v403_v46  ;;  %949 = vlog2.f32 %v510_v50  ;;  %vm579_vm6 = vcmp.eq.f32.partialorder %v1171_v35, 0.0 }
 0x10c   : > { %v721_v53 = vsub.f32 %v1175_v39, %v1178_v43  ;;  %v459_v57 = vpop.f32.mrb[11].mxu1  ;;  %v938_v58 = vpop.eup %937  ;;  %v1189_v60 = vmul.f32 %v546_v51, %v510_v50  ;;  %v1191_v61 = vadd.f32 %v546_v51, %v510_v50  ;;  %v1198_v3 = vadd.f32 %v669_v37, %v546_v51 }
 0x10d   : > { %v564_v59 = vsel %vm563_vm1, %v1157_v63, %v562_v48  ;;  %v940_v62 = vpop.eup %939  ;;  %v1195_v2 = vmul.f32 0.6931472, %v938_v58  ;;  %951 = vlog2.f32 %v546_v51  ;;  %v502_v63 = vadd.f32 %v493_v54, %v484_v44 }
 0x10e   : > { %v567_v1 = vsel %vm565_vm2, %v566_v29, %v564_v59  ;;  %v409_v4 = vpop.f32.mrb[12].mxu0  ;;  %v463_v5 = vpop.f32.mrb[12].mxu1  ;;  %v1202_v8 = vmul.f32 0.6931472, %v940_v62  ;;  %953 = vrsqrt.f32 %v1189_v60  ;;  %v538_v12 = vadd.f32 %v529_v55, %v520_v45 }
 0x10f   : > { %v942_v6 = vpop.eup %941  ;;  %v1200_v7 = vmul.f32 2.0, %v567_v1  ;;  %v411_v9 = vpop.f32.mrb[13].mxu0  ;;  %v521_v13 = vmul.f32 %v457_v47, %v457_v47  ;;  %v494_v14 = vmul.f32 %v405_v52, %v405_v52  ;;  %v511_v19 = vmax.f32 %v502_v63, 1e-08 }
 0x110   : > { %v465_v10 = vpop.f32.mrb[13].mxu1  ;;  %v569_v11 = vmul.f32 %v942_v6, %v1162_v15  ;;  %v722_v18 = vsub.f32 %v1195_v2, %v1202_v8  ;;  %v530_v20 = vmul.f32 %v459_v57, %v459_v57  ;;  %v944_v21 = vpop.eup %943  ;;  %v1214_v23 = vmax.f32 %v538_v12, 1e-08 }
 0x111   : > { %v642_v17 = vsub.f32 %v1159_v0, %v1200_v7  ;;  %v503_v24 = vadd.f32 %v494_v14, %v485_v56  ;;  %v486_v25 = vmul.f32 %v409_v4, %v409_v4  ;;  %v946_v28 = vpop.eup %945  ;;  %v1220_v31 = vmul.f32 0.6931472, %v944_v21 }
 0x112   : > { %v571_v22 = vsel %vm570_vm3, %v1162_v15, %v569_v11  ;;  %v415_v26 = vpop.f32.mrb[14].mxu0  ;;  %v469_v27 = vpop.f32.mrb[14].mxu1  ;;  %955 = vlog2.f32 %v511_v19  ;;  %v539_v32 = vadd.f32 %v530_v20, %v521_v13  ;;  %v1224_v40 = vmul.f32 0.6931472, %v946_v28 }
 0x113   : > { %v574_v29 = vsel %vm572_vm4, %v573_v30, %v571_v22  ;;  %v417_v33 = vpop.f32.mrb[15].mxu0  ;;  %v471_v34 = vpop.f32.mrb[15].mxu1  ;;  %v1227_v41 = vmul.f32 %v1214_v23, %v511_v19  ;;  %v1230_v42 = vadd.f32 %v1214_v23, %v511_v19  ;;  %957 = vlog2.f32 %v1214_v23 }
 0x114   : > { %v948_v37 = vpop.eup %947  ;;  %v1222_v38 = vmul.f32 2.0, %v574_v29  ;;  %v1234_v30 = vmax.f32 %v503_v24, 1e-08  ;;  %v1236_v44 = vmax.f32 %v539_v32, 1e-08  ;;  %v522_v46 = vmul.f32 %v463_v5, %v463_v5 }
 0x115   : > { %v576_v15 = vmul.f32 %v948_v37, %v1171_v35  ;;  %959 = vrsqrt.f32 %v1227_v41  ;;  %v495_v47 = vmul.f32 %v411_v9, %v411_v9  ;;  %v950_v51 = vpop.eup %949  ;;  %v531_v55 = vmul.f32 %v465_v10, %v465_v10 }
 0x116   : > { %v643_v45 = vsub.f32 %v1164_v16, %v1222_v38  ;;  %v421_v48 = vpop.f32.mrb[16].mxu0  ;;  %v475_v50 = vpop.f32.mrb[16].mxu1  ;;  %961 = vlog2.f32 %v1234_v30  ;;  %v1247_v54 = vmul.f32 %v1236_v44, %v1234_v30  ;;  %v692_v62 = vmul.f32 0.6931472, %v950_v51 }
 0x117   : > { %v578_v52 = vsel %vm577_vm5, %v1171_v35, %v576_v15  ;;  %v423_v56 = vpop.f32.mrb[17].mxu0  ;;  %v477_v57 = vpop.f32.mrb[17].mxu1  ;;  %963 = vlog2.f32 %v1236_v44  ;;  %v504_v1 = vadd.f32 %v495_v47, %v486_v25  ;;  %v540_v63 = vadd.f32 %v531_v55, %v522_v46 }
 0x118   : > { %v952_v58 = vpop.eup %951  ;;  %v581_v59 = vsel %vm579_vm6, %v580_v49, %v578_v52  ;;  %v487_v9 = vmul.f32 %v415_v26, %v415_v26  ;;  %v523_v10 = vmul.f32 %v469_v27, %v469_v27  ;;  %v496_v12 = vmul.f32 %v417_v33, %v417_v33 }
 0x119   : > { %v954_v4 = vpop.eup %953  ;;  %v1254_v5 = vmul.f32 2.0, %v581_v59  ;;  %v710_v6 = vmul.f32 0.6931472, %v952_v58  ;;  %v1256_v11 = vmax.f32 %v504_v1, 1e-08  ;;  %v532_v13 = vmul.f32 %v471_v34, %v471_v34 }
 0x11a   : > { %v1260_v35 = vmax.f32 %v540_v63, 1e-08  ;;  %v488_v49 = vmul.f32 %v421_v48, %v421_v48  ;;  %v524_v19 = vmul.f32 %v475_v50, %v475_v50  ;;  %v505_v20 = vadd.f32 %v496_v12, %v487_v9 }
 0x11b   : > { %v644_v14 = vsub.f32 %v1173_v36, %v1254_v5  ;;  %965 = vlog2.f32 %v1256_v11  ;;  %v541_v21 = vadd.f32 %v532_v13, %v523_v10  ;;  %v497_v22 = vmul.f32 %v423_v56, %v423_v56 }
 0x11c   : > { %v956_v24 = vpop.eup %955  ;;  %v1265_v25 = vmul.f32 %v1260_v35, %v1256_v11  ;;  %967 = vlog2.f32 %v1260_v35  ;;  %v533_v26 = vmul.f32 %v477_v57, %v477_v57  ;;  %v723_v27 = vsub.f32 %v1220_v31, %v1224_v40 }
 0x11d   : > { %v694_v28 = vmul.f32 0.6931472, %v956_v24  ;;  %v1270_v29 = vmax.f32 %v505_v20, 1e-08  ;;  %v1272_v32 = vmax.f32 %v541_v21, 1e-08  ;;  %v506_v33 = vadd.f32 %v497_v22, %v488_v49  ;;  %v958_v34 = vpop.eup %957 }
 0x11e   : > { %v542_v37 = vadd.f32 %v533_v26, %v524_v19  ;;  %v724_v15 = vsub.f32 %v692_v62, %v710_v6  ;;  %v730_v46 = vand.u32 2147483647, %v721_v53  ;;  %v731_v47 = vand.u32 2147483647, %v722_v18 }
 0x11f   : > { %v960_v48 = vpop.eup %959  ;;  %969 = vlog2.f32 %v1270_v29  ;;  %v1283_v31 = vmul.f32 %v1272_v32, %v1270_v29  ;;  %v515_v40 = vmax.f32 %v506_v33, 1e-08  ;;  %v712_v50 = vmul.f32 0.6931472, %v958_v34 }
 0x120   : > { %v962_v51 = vpop.eup %961  ;;  %v1285_v52 = vmax.f32 %v542_v37, 1e-08  ;;  %971 = vlog2.f32 %v1272_v32  ;;  %v732_v39 = vand.u32 2147483647, %v723_v27  ;;  %v733_v43 = vand.u32 2147483647, %v724_v15 }
 0x121   : > { %v964_v53 = vpop.eup %963  ;;  %v696_v55 = vmul.f32 0.6931472, %v962_v51  ;;  %973 = vlog2.f32 %v515_v40  ;;  %v725_v2 = vsub.f32 %v694_v28, %v712_v50  ;;  %v739_v8 = vadd.f32 %v731_v47, %v730_v46 }
 0x122   : > { %v1289_v18 = vmul.f32 %v1285_v52, %v515_v40  ;;  %v714_v56 = vmul.f32 0.6931472, %v964_v53  ;;  %975 = vlog2.f32 %v1285_v52  ;;  %v583_v62 = vmul.f32 %v954_v4, %v1189_v60 }
 0x123   : > { %v734_v57 = vand.u32 2147483647, %v725_v2  ;;  %v740_v58 = vadd.f32 %v739_v8, %v732_v39  ;;  %v590_v63 = vmul.f32 %v960_v48, %v1227_v41  ;;  %vm584_vm7 = vcmp.eq.f32.partialorder %v1189_v60, inf }
 0x124   : > { %v726_v59 = vsub.f32 %v696_v55, %v714_v56  ;;  %977 = vrsqrt.f32 %v1247_v54  ;;  %v585_v19 = vsel %vm584_vm7, %v1189_v60, %v583_v62  ;;  %vm591_vm8 = vcmp.eq.f32.partialorder %v1227_v41, inf }
 0x125   : > { %v966_v1 = vpop.eup %965  ;;  %v741_v6 = vadd.f32 %v740_v58, %v733_v43  ;;  %979 = vrsqrt.f32 %v1265_v25  ;;  %v587_v22 = vand.u32 2147483648, %v1189_v60  ;;  %v592_v24 = vsel %vm591_vm8, %v1227_v41, %v590_v63 }
 0x126   : > { %v968_v9 = vpop.eup %967  ;;  %v698_v10 = vmul.f32 0.6931472, %v966_v1  ;;  %v735_v12 = vand.u32 2147483647, %v726_v59  ;;  %vm586_vm9 = vcmp.eq.f32.partialorder %v1189_v60, 0.0  ;;  %v594_v28 = vand.u32 2147483648, %v1227_v41 }
 0x127   : > { %v716_v13 = vmul.f32 0.6931472, %v968_v9  ;;  %v742_v49 = vadd.f32 %v741_v6, %v734_v57  ;;  %981 = vrsqrt.f32 %v1283_v31  ;;  %v588_v15 = vsel %vm586_vm9, %v587_v22, %v585_v19 }
 0x128   : > { %vm593_vm10 = vcmp.eq.f32.partialorder %v1227_v41, 0.0  ;;  %vm598_vm11 = vcmp.eq.f32.partialorder %v1247_v54, inf  ;;  %983 = vrsqrt.f32 %v1289_v18  ;;  %vm600_vm12 = vcmp.eq.f32.partialorder %v1247_v54, 0.0 }
 0x129   : > { %v970_v4 = vpop.eup %969  ;;  %v727_v20 = vsub.f32 %v698_v10, %v716_v13  ;;  %v743_v21 = vadd.f32 %v742_v49, %v735_v12  ;;  %v595_v48 = vsel %vm593_vm10, %v594_v28, %v592_v24  ;;  %v629_v39 = vadd.f32 %v1236_v44, %v1234_v30 }
 0x12a   : > { %v972_v26 = vpop.eup %971  ;;  %v700_v27 = vmul.f32 0.6931472, %v970_v4  ;;  %v630_v43 = vadd.f32 %v1260_v35, %v1256_v11  ;;  %v631_v41 = vadd.f32 %v1272_v32, %v1270_v29  ;;  %v632_v53 = vadd.f32 %v1285_v52, %v515_v40 }
 0x12b   : > { %v974_v33 = vpop.eup %973  ;;  %v718_v34 = vmul.f32 0.6931472, %v972_v26  ;;  %v736_v37 = vand.u32 2147483647, %v727_v20  ;;  %v636_v8 = vmul.f32 2.0, %v588_v15  ;;  %v637_v56 = vmul.f32 2.0, %v595_v48 }
 0x12c   : > { %v976_v46 = vpop.eup %975  ;;  %v702_v47 = vmul.f32 0.6931472, %v974_v33  ;;  %v601_v57 = vand.u32 2147483648, %v1247_v54  ;;  %vm605_vm13 = vcmp.eq.f32.partialorder %v1265_v25, inf  ;;  %v651_v30 = vadd.f32 %v643_v45, %v642_v17 }
 0x12d   : > { %v720_v50 = vmul.f32 0.6931472, %v976_v46  ;;  %v728_v51 = vsub.f32 %v700_v27, %v718_v34  ;;  %v744_v60 = vadd.f32 %v743_v21, %v736_v37  ;;  %v671_v11 = vadd.f32 %v1198_v3, %v1214_v23 }
 0x12e   : > { %v978_v29 = vpop.eup %977  ;;  %v645_v59 = vsub.f32 %v1191_v61, %v636_v8  ;;  %v646_v62 = vsub.f32 %v1230_v42, %v637_v56  ;;  %vm607_vm14 = vcmp.eq.f32.partialorder %v1265_v25, 0.0  ;;  %v652_v0 = vadd.f32 %v651_v30, %v644_v14 }
 0x12f   : > { %v729_v55 = vsub.f32 %v702_v47, %v720_v50  ;;  %v737_v2 = vand.u32 2147483647, %v728_v51  ;;  %v980_v1 = vpop.eup %979  ;;  %v597_v6 = vmul.f32 %v978_v29, %v1247_v54  ;;  %v672_v16 = vadd.f32 %v671_v11, %v1236_v44 }
 0x130   : > { %v604_v3 = vmul.f32 %v980_v1, %v1265_v25  ;;  %v608_v17 = vand.u32 2147483648, %v1265_v25  ;;  %vm612_vm15 = vcmp.eq.f32.partialorder %v1283_v31, inf  ;;  %vm614_vm0 = vcmp.eq.f32.partialorder %v1283_v31, 0.0 }
 0x131   : > { %v738_v40 = vand.u32 2147483647, %v729_v55  ;;  %v745_v58 = vadd.f32 %v744_v60, %v737_v2  ;;  %v982_v61 = vpop.eup %981  ;;  %v599_v23 = vsel %vm598_vm11, %v1247_v54, %v597_v6  ;;  %v653_v38 = vadd.f32 %v652_v0, %v645_v59 }
 0x132   : > { %v673_v36 = vadd.f32 %v672_v16, %v1260_v35  ;;  %v602_v42 = vsel %vm600_vm12, %v601_v57, %v599_v23  ;;  %v606_v44 = vsel %vm605_vm13, %v1265_v25, %v604_v3  ;;  %v611_v45 = vmul.f32 %v982_v61, %v1283_v31  ;;  %v984_v14 = vpop.eup %983 }
 0x133   : > { %v746_v7 = vadd.f32 %v745_v58, %v738_v40  ;;  %v615_v5 = vand.u32 2147483648, %v1283_v31  ;;  %v609_v63 = vsel %vm607_vm14, %v608_v17, %v606_v44  ;;  %v638_v9 = vmul.f32 2.0, %v602_v42 }
 0x134   : > { %v654_v10 = vadd.f32 %v653_v38, %v646_v62  ;;  %v674_v35 = vadd.f32 %v673_v36, %v1272_v32  ;;  %v613_v54 = vsel %vm612_vm15, %v1283_v31, %v611_v45  ;;  %v618_v12 = vmul.f32 %v984_v14, %v1289_v18 }
 0x135   : > { %747 = vadd.xlane.f32.xlu1 %v746_v7  ;;  %vm619_vm1 = vcmp.eq.f32.partialorder %v1289_v18, inf  ;;  %v639_v13 = vmul.f32 2.0, %v609_v63  ;;  %v616_v49 = vsel %vm614_vm0, %v615_v5, %v613_v54  ;;  %v622_v19 = vand.u32 2147483648, %v1289_v18 }
 0x136   : > { %v647_v25 = vsub.f32 %v629_v39, %v638_v9  ;;  %v675_v4 = vadd.f32 %v674_v35, %v1285_v52  ;;  %v620_v20 = vsel %vm619_vm1, %v1289_v18, %v618_v12  ;;  %vm621_vm2 = vcmp.eq.f32.partialorder %v1289_v18, 0.0 }
 0x137   : > { %v640_v32 = vmul.f32 2.0, %v616_v49  ;;  %v648_v21 = vsub.f32 %v630_v43, %v639_v13  ;;  %v623_v22 = vsel %vm621_vm2, %v622_v19, %v620_v20  ;;  %v757_v29 = vlaneseq }
 0x138   : > { %v655_v24 = vadd.f32 %v654_v10, %v647_v25  ;;  %v641_v26 = vmul.f32 2.0, %v623_v22 }
 0x139   : > { %v649_v27 = vsub.f32 %v631_v41, %v640_v32  ;;  %v758_v40 = vshrl.u32 %v757_v29, 7 }
 0x13a   : > { %v656_v28 = vadd.f32 %v655_v24, %v648_v21  ;;  %v650_v33 = vsub.f32 %v632_v53, %v641_v26 }
 0x13b   : > { %vm759_vm3 = vcmp.eq.s32.totalorder %v758_v40, 0  ;;  %vm762_vm4 = vcmp.eq.s32.totalorder %v758_v40, 1  ;;  %vm766_vm5 = vcmp.eq.s32.totalorder %v758_v40, 2 }
 0x13c   : > { %v657_v34 = vadd.f32 %v656_v28, %v649_v27 }
 0x13e   : > { %v658_v31 = vadd.f32 %v657_v34, %v650_v33 }
 0x140   : > { %659 = vadd.xlane.f32.xlu0 %v658_v31 }
 0x144   : > { %676 = vadd.xlane.f32.xlu0 %v675_v4 }
 0x1c2   : > { %v748_v37 = vpop.xlane.xlu1 %747 }
 0x1c3   : > { %v749_v15 = vrot.slane %v748_v37, 4 }
 0x1c5   : > { %v750_v46 = vadd.f32 %v749_v15, %v748_v37 }
 0x1c7   : > { %v751_v50 = vrot.slane %v750_v46, 2 }
 0x1c9   : > { %v752_v55 = vadd.f32 %v751_v50, %v750_v46 }
 0x1cb   : > { %v753_v56 = vrot.slane %v752_v55, 1 }
 0x1cd   : > { %v660_v52 = vpop.xlane.xlu0 %659  ;;  %v754_v11 = vadd.f32 %v753_v56, %v752_v55 }
 0x1ce   : > { %v661_v47 = vrot.slane %v660_v52, 4 }
 0x1d0   : > { %v662_v48 = vadd.f32 %v661_v47, %v660_v52 }
 0x1d1   : > { %v677_v18 = vpop.xlane.xlu0 %676 }
 0x1d2   : > { %v663_v51 = vrot.slane %v662_v48, 2  ;;  %v678_v60 = vrot.slane %v677_v18, 4 }
 0x1d4   : > { %v679_v39 = vadd.f32 %v678_v60, %v677_v18  ;;  %v664_v43 = vadd.f32 %v663_v51, %v662_v48 }
 0x1d6   : > { %v680_v41 = vrot.slane %v679_v39, 2  ;;  %v665_v2 = vrot.slane %v664_v43, 1 }
 0x1d8   : > { %v681_v53 = vadd.f32 %v680_v41, %v679_v39  ;;  %v666_v8 = vadd.f32 %v665_v2, %v664_v43 }
 0x1da   : > { %900 = vpush %v666_v8  ;;  %v682_v57 = vrot.slane %v681_v53, 1 }
 0x1dc   : > { %v683_v30 = vadd.f32 %v682_v57, %v681_v53 }
 0x1de   : > { %902 = vpush %v683_v30 }
 0x1df   : > { %904 = vpush %v754_v11 }
 0x20b   : > { %s901_s9 = spop %900 }
 0x20c   : > { %v760_v58 = vstv %s901_s9 }
 0x20d   : > { %v761_v62 = vsel %vm759_vm3, %v760_v58, 0.0 }
 0x20f   : > { %s903_s13 = spop %902 }
 0x210   : > { %v763_v59 = vstv %s903_s13  ;;  %s905_s3 = spop %904 }
 0x211   : > { %v764_v1 = vsel %vm762_vm4, %v763_v59, 0.0  ;;  %s756_s4 = smul.f32 0.5, %s905_s3 }
 0x212   : > { %v765_v6 = vadd.f32 %v764_v1, %v761_v62 }
 0x213   : > { %v767_v0 = vstv %s756_s4 }
 0x214   : > { %v768_v16 = vsel %vm766_vm5, %v767_v0, 0.0 }
 0x215   : > { %v769_v7 = vadd.f32 %v768_v16, %v765_v6 }
 0x217   : > { %772 = vst [vmem:[%s1096_s27] sm:$0xff] %v769_v7 }
 0x218 PF: > { %s12_s11 = sadd.s32 1, %s1009_s11   ;;  %s1375_s9 = smov %s1005_s10 }
 0x219   : > { %p9_p6 = scmp.ge.s32.totalorder %s12_s11, 4   ;;  %s1376_s10 = smov %s1378_s12 }
 0x21b   :  { %11 = sbr.rel (!%p9_p6) target bundleno = 2 (0x2), region = 100 }
 0x222   :  { %792 = vsyncmov [#allocation3] }
 0x225   :  { %s793_s5 = vpop.sfrf %792 }
 0x226   :  { %p875_p7 = scmp.ne.s32.totalorder %s793_s5, 0 }
 0x228   :  { %797 = shalt.err (%p875_p7)  }

// kernel: _lambda_.4
= control target key start
LH: loop header
LB: loop body
LE: loop exit
PB: predicated region body
PF: predicated region fallthrough
CT: control target
= control target key end

     0   :  { %s1319_s9 = smov 0   ;;  %s1321_s10 = smov 0   ;;  %s2286_s0 = inlined_call_operand.vmem [shape: f32[96,256], index: 0, kind: input, shape index: {}]   ;;  %s2287_s1 = inlined_call_operand.vmem [shape: f32[256,512], index: 1, kind: input, shape index: {}]   ;;  %s2288_s2 = inlined_call_operand.vmem [shape: f32[2,8,128], index: 2, kind: output, shape index: {}]  }
   0x1   :  { %s1323_s11 = smov 0  }
   0x2 LB: > { %s24_s12 = sadd.s32 1, %s1298_s10  ;;  %p1075_p0 = scmp.ge.s32.totalorder %s1302_s11, 1  ;;  %s1302_s11 = sphi %s1323_s11, %s12_s11   ;;  %s1298_s10 = sphi %s1321_s10, %s2430_s10   ;;  %s1294_s9 = sphi %s1319_s9, %s2429_s9  }
   0x3   : > { %p26_p1 = scmp.ge.s32.totalorder %s24_s12, 2  ;;  %p106_p2 = scmp.lt.s32.totalorder %s1302_s11, 3 }
   0x5   : > { %s2432_s12 = smov (%p26_p1, %s24_s12), 0  ;;  %p107_p3 = pnand %p1075_p0, %p106_p2 }
   0x7   : > { %110 = sbr.rel (%p107_p3) target bundleno = 618 (0x26a), region = 24 }
   0xe   : > { %s128_s13 = smul.u32 6, %s1294_s9  ;;  %p136_p4 = scmp.lt.s32.totalorder %s1294_s9, 1  ;;  %v1340_v0 = vld [vmem:[%s2287_s1] sm:$0xff]  ;;  %v1345_v1 = vld [vmem:[%s2287_s1 + $0x8] sm:$0xff]  ;;  %v1350_v2 = vld [vmem:[%s2287_s1 + $0x10] sm:$0xff] }
   0xf   : > { %v1355_v3 = vld [vmem:[%s2287_s1 + $0x18] sm:$0xff]  ;;  %v1360_v4 = vld [vmem:[%s2287_s1 + $0x20] sm:$0xff]  ;;  %v1365_v5 = vld [vmem:[%s2287_s1 + $0x28] sm:$0xff] }
  0x10   : > { %p129_p5 = scmp.lt.s32.totalorder %s128_s13, 11  ;;  %v1370_v6 = vld [vmem:[%s2287_s1 + $0x30] sm:$0xff]  ;;  %v1375_v7 = vld [vmem:[%s2287_s1 + $0x38] sm:$0xff]  ;;  %v1380_v8 = vld [vmem:[%s2287_s1 + $0x40] sm:$0xff]  ;;  %s2434_s9 = smov (!%p136_p4, %s1294_s9), 1 }
  0x11   : > { %v1385_v9 = vld [vmem:[%s2287_s1 + $0x48] sm:$0xff]  ;;  %v1390_v10 = vld [vmem:[%s2287_s1 + $0x50] sm:$0xff]  ;;  %v1395_v11 = vld [vmem:[%s2287_s1 + $0x58] sm:$0xff]  ;;  %s1078_s21 = sshll.u32 %s2434_s9, 3 }
  0x12   : > { %s2436_s13 = smov (!%p129_p5, %s128_s13), 11  ;;  %v1400_v12 = vld [vmem:[%s2287_s1 + $0x60] sm:$0xff]  ;;  %v1405_v13 = vld [vmem:[%s2287_s1 + $0x68] sm:$0xff]  ;;  %v1410_v14 = vld [vmem:[%s2287_s1 + $0x70] sm:$0xff]  ;;  %s1430_s9 = scalar_lea.vmem %s2288_s2, %s1078_s21 }
  0x13   : > { %v1415_v15 = vld [vmem:[%s2287_s1 + $0x78] sm:$0xff]  ;;  %v1420_v16 = vld [vmem:[%s2287_s1 + $0x80] sm:$0xff]  ;;  %v1425_v17 = vld [vmem:[%s2287_s1 + $0x88] sm:$0xff]  ;;  %s1082_s28 = sshll.u32 %s2436_s13, 4 }
  0x14   : > { %v1435_v18 = vld [vmem:[%s2287_s1 + $0x90] sm:$0xff]  ;;  %v1440_v19 = vld [vmem:[%s2287_s1 + $0x98] sm:$0xff]  ;;  %v1445_v20 = vld [vmem:[%s2287_s1 + $0xa0] sm:$0xff]  ;;  %s1450_s15 = scalar_lea.vmem %s2286_s0, %s1082_s28 }
  0x15   : > { %v1455_v21 = vld [vmem:[%s2287_s1 + $0xa8] sm:$0xff]  ;;  %v1460_v22 = vld [vmem:[%s2287_s1 + $0xb0] sm:$0xff]  ;;  %v1465_v23 = vld [vmem:[%s2287_s1 + $0xb8] sm:$0xff] }
  0x16   : > { %v1470_v24 = vld [vmem:[%s2287_s1 + $0xc0] sm:$0xff]  ;;  %v1475_v25 = vld [vmem:[%s2287_s1 + $0xc8] sm:$0xff]  ;;  %v1480_v26 = vld [vmem:[%s2287_s1 + $0xd0] sm:$0xff] }
  0x17   : > { %v1485_v27 = vld [vmem:[%s2287_s1 + $0xd8] sm:$0xff]  ;;  %v1490_v28 = vld [vmem:[%s2287_s1 + $0xe0] sm:$0xff]  ;;  %v1495_v29 = vld [vmem:[%s2287_s1 + $0xe8] sm:$0xff] }
  0x18   : > { %v1500_v30 = vld [vmem:[%s2287_s1 + $0xf0] sm:$0xff]  ;;  %v1505_v31 = vld [vmem:[%s2287_s1 + $0xf8] sm:$0xff]  ;;  %v1510_v32 = vld [vmem:[%s2287_s1 + $0x100] sm:$0xff] }
  0x19   : > { %v1515_v33 = vld [vmem:[%s2287_s1 + $0x108] sm:$0xff]  ;;  %v1520_v34 = vld [vmem:[%s2287_s1 + $0x110] sm:$0xff]  ;;  %v1525_v35 = vld [vmem:[%s2287_s1 + $0x118] sm:$0xff] }
  0x1a   : > { %v1530_v36 = vld [vmem:[%s2287_s1 + $0x120] sm:$0xff]  ;;  %v1535_v37 = vld [vmem:[%s2287_s1 + $0x128] sm:$0xff]  ;;  %v1540_v38 = vld [vmem:[%s2287_s1 + $0x130] sm:$0xff] }
  0x1b   : > { %v1545_v39 = vld [vmem:[%s2287_s1 + $0x138] sm:$0xff]  ;;  %v1550_v40 = vld [vmem:[%s2287_s1 + $0x140] sm:$0xff]  ;;  %v1555_v41 = vld [vmem:[%s2287_s1 + $0x148] sm:$0xff] }
  0x1c   : > { %v1560_v42 = vld [vmem:[%s2287_s1 + $0x150] sm:$0xff]  ;;  %v1565_v43 = vld [vmem:[%s2287_s1 + $0x158] sm:$0xff]  ;;  %v1570_v44 = vld [vmem:[%s2287_s1 + $0x160] sm:$0xff] }
  0x1d   : > { %v1575_v45 = vld [vmem:[%s2287_s1 + $0x168] sm:$0xff]  ;;  %v1580_v46 = vld [vmem:[%s2287_s1 + $0x170] sm:$0xff]  ;;  %v1585_v47 = vld [vmem:[%s2287_s1 + $0x178] sm:$0xff] }
  0x1e   : > { %v1590_v48 = vld [vmem:[%s2287_s1 + $0x180] sm:$0xff]  ;;  %v1595_v49 = vld [vmem:[%s2287_s1 + $0x188] sm:$0xff]  ;;  %v1600_v50 = vld [vmem:[%s2287_s1 + $0x190] sm:$0xff] }
  0x1f   : > { %v1605_v51 = vld [vmem:[%s2287_s1 + $0x198] sm:$0xff]  ;;  %v1610_v52 = vld [vmem:[%s2287_s1 + $0x1a0] sm:$0xff]  ;;  %v1615_v53 = vld [vmem:[%s2287_s1 + $0x1a8] sm:$0xff] }
  0x20   : > { %v1620_v54 = vld [vmem:[%s2287_s1 + $0x1b0] sm:$0xff]  ;;  %v1625_v55 = vld [vmem:[%s2287_s1 + $0x1b8] sm:$0xff]  ;;  %v1630_v56 = vld [vmem:[%s2287_s1 + $0x1c0] sm:$0xff] }
  0x21   : > { %2289 = vst [vmem:[#allocation6_spill] sm:$0xff] %v1630_v56  ;;  %v1635_v57 = vld [vmem:[%s2287_s1 + $0x1c8] sm:$0xff]  ;;  %v1640_v58 = vld [vmem:[%s2287_s1 + $0x1d0] sm:$0xff]  ;;  %v1645_v59 = vld [vmem:[%s2287_s1 + $0x1d8] sm:$0xff] }
  0x22   : > { %2290 = vst [vmem:[#allocation7_spill] sm:$0xff] %v1640_v58  ;;  %2291 = vst [vmem:[#allocation8_spill] sm:$0xff] %v1645_v59  ;;  %v1650_v60 = vld [vmem:[%s2287_s1 + $0x1e0] sm:$0xff]  ;;  %v1655_v61 = vld [vmem:[%s2287_s1 + $0x1e8] sm:$0xff] }
  0x23   : > { %2292 = vst [vmem:[#allocation9_spill] sm:$0xff] %v1650_v60  ;;  %v1660_v62 = vld [vmem:[%s2287_s1 + $0x1f0] sm:$0xff]  ;;  %v1665_v63 = vld [vmem:[%s2287_s1 + $0x1f8] sm:$0xff]  ;;  %v1670_v58 = vld [vmem:[%s2287_s1 + $0x200] sm:$0xff] }
  0x24   : > { %2293 = vst [vmem:[#allocation10_spill] sm:$0xff] %v1660_v62  ;;  %2294 = vst [vmem:[#allocation11_spill] sm:$0xff] %v1665_v63  ;;  %v1675_v60 = vld [vmem:[%s2287_s1 + $0x208] sm:$0xff]  ;;  %v1680_v56 = vld [vmem:[%s2287_s1 + $0x210] sm:$0xff] }
  0x25   : > { %2295 = vst [vmem:[#allocation12_spill] sm:$0xff] %v1670_v58  ;;  %2296 = vst [vmem:[#allocation13_spill] sm:$0xff] %v1675_v60  ;;  %v1685_v62 = vld [vmem:[%s2287_s1 + $0x218] sm:$0xff]  ;;  %v1690_v63 = vld [vmem:[%s2287_s1 + $0x220] sm:$0xff] }
  0x26   : > { %2297 = vst [vmem:[#allocation14_spill] sm:$0xff] %v1680_v56  ;;  %2298 = vst [vmem:[#allocation15_spill] sm:$0xff] %v1685_v62  ;;  %v1695_v58 = vld [vmem:[%s2287_s1 + $0x228] sm:$0xff]  ;;  %v1700_v60 = vld [vmem:[%s2287_s1 + $0x230] sm:$0xff] }
  0x27   : > { %2299 = vst [vmem:[#allocation16_spill] sm:$0xff] %v1690_v63  ;;  %2300 = vst [vmem:[#allocation17_spill] sm:$0xff] %v1695_v58  ;;  %v1705_v56 = vld [vmem:[%s2287_s1 + $0x238] sm:$0xff]  ;;  %v1710_v62 = vld [vmem:[%s2287_s1 + $0x240] sm:$0xff] }
  0x28   : > { %2301 = vst [vmem:[#allocation18_spill] sm:$0xff] %v1700_v60  ;;  %2302 = vst [vmem:[#allocation19_spill] sm:$0xff] %v1705_v56  ;;  %v1715_v63 = vld [vmem:[%s2287_s1 + $0x248] sm:$0xff]  ;;  %v1720_v58 = vld [vmem:[%s2287_s1 + $0x250] sm:$0xff] }
  0x29   : > { %2303 = vst [vmem:[#allocation20_spill] sm:$0xff] %v1710_v62  ;;  %2304 = vst [vmem:[#allocation21_spill] sm:$0xff] %v1715_v63  ;;  %v1725_v60 = vld [vmem:[%s2287_s1 + $0x258] sm:$0xff]  ;;  %v1730_v56 = vld [vmem:[%s2287_s1 + $0x260] sm:$0xff] }
  0x2a   : > { %2305 = vst [vmem:[#allocation22_spill] sm:$0xff] %v1720_v58  ;;  %2306 = vst [vmem:[#allocation23_spill] sm:$0xff] %v1725_v60  ;;  %v1735_v62 = vld [vmem:[%s2287_s1 + $0x268] sm:$0xff]  ;;  %v1740_v63 = vld [vmem:[%s2287_s1 + $0x270] sm:$0xff] }
  0x2b   : > { %2307 = vst [vmem:[#allocation24_spill] sm:$0xff] %v1730_v56  ;;  %2308 = vst [vmem:[#allocation25_spill] sm:$0xff] %v1735_v62  ;;  %v1745_v58 = vld [vmem:[%s2287_s1 + $0x278] sm:$0xff]  ;;  %v1750_v60 = vld [vmem:[%s2287_s1 + $0x280] sm:$0xff] }
  0x2c   : > { %2309 = vst [vmem:[#allocation26_spill] sm:$0xff] %v1740_v63  ;;  %2310 = vst [vmem:[#allocation27_spill] sm:$0xff] %v1745_v58  ;;  %v1755_v56 = vld [vmem:[%s2287_s1 + $0x288] sm:$0xff]  ;;  %v1760_v62 = vld [vmem:[%s2287_s1 + $0x290] sm:$0xff] }
  0x2d   : > { %2311 = vst [vmem:[#allocation28_spill] sm:$0xff] %v1750_v60  ;;  %2312 = vst [vmem:[#allocation29_spill] sm:$0xff] %v1755_v56  ;;  %v1765_v63 = vld [vmem:[%s2287_s1 + $0x298] sm:$0xff]  ;;  %v1770_v58 = vld [vmem:[%s2287_s1 + $0x2a0] sm:$0xff] }
  0x2e   : > { %2313 = vst [vmem:[#allocation30_spill] sm:$0xff] %v1760_v62  ;;  %2314 = vst [vmem:[#allocation31_spill] sm:$0xff] %v1765_v63  ;;  %v1775_v60 = vld [vmem:[%s2287_s1 + $0x2a8] sm:$0xff]  ;;  %v1780_v56 = vld [vmem:[%s2287_s1 + $0x2b0] sm:$0xff] }
  0x2f   : > { %2315 = vst [vmem:[#allocation32_spill] sm:$0xff] %v1770_v58  ;;  %2316 = vst [vmem:[#allocation33_spill] sm:$0xff] %v1775_v60  ;;  %v1785_v62 = vld [vmem:[%s2287_s1 + $0x2b8] sm:$0xff]  ;;  %v1790_v63 = vld [vmem:[%s2287_s1 + $0x2c0] sm:$0xff] }
  0x30   : > { %2317 = vst [vmem:[#allocation34_spill] sm:$0xff] %v1780_v56  ;;  %2318 = vst [vmem:[#allocation35_spill] sm:$0xff] %v1785_v62  ;;  %v1795_v58 = vld [vmem:[%s2287_s1 + $0x2c8] sm:$0xff]  ;;  %v1800_v60 = vld [vmem:[%s2287_s1 + $0x2d0] sm:$0xff] }
  0x31   : > { %2319 = vst [vmem:[#allocation36_spill] sm:$0xff] %v1790_v63  ;;  %2320 = vst [vmem:[#allocation37_spill] sm:$0xff] %v1795_v58  ;;  %v1805_v56 = vld [vmem:[%s2287_s1 + $0x2d8] sm:$0xff]  ;;  %v1810_v62 = vld [vmem:[%s2287_s1 + $0x2e0] sm:$0xff] }
  0x32   : > { %2321 = vst [vmem:[#allocation38_spill] sm:$0xff] %v1800_v60  ;;  %2322 = vst [vmem:[#allocation39_spill] sm:$0xff] %v1805_v56  ;;  %v1815_v63 = vld [vmem:[%s2287_s1 + $0x2e8] sm:$0xff]  ;;  %v1820_v58 = vld [vmem:[%s2287_s1 + $0x2f0] sm:$0xff] }
  0x33   : > { %2323 = vst [vmem:[#allocation40_spill] sm:$0xff] %v1810_v62  ;;  %2324 = vst [vmem:[#allocation41_spill] sm:$0xff] %v1815_v63  ;;  %v1825_v60 = vld [vmem:[%s2287_s1 + $0x2f8] sm:$0xff]  ;;  %v1830_v56 = vld [vmem:[%s2287_s1 + $0x300] sm:$0xff] }
  0x34   : > { %2325 = vst [vmem:[#allocation42_spill] sm:$0xff] %v1820_v58  ;;  %2326 = vst [vmem:[#allocation43_spill] sm:$0xff] %v1825_v60  ;;  %v1835_v62 = vld [vmem:[%s2287_s1 + $0x308] sm:$0xff]  ;;  %v1840_v63 = vld [vmem:[%s2287_s1 + $0x310] sm:$0xff] }
  0x35   : > { %2327 = vst [vmem:[#allocation44_spill] sm:$0xff] %v1830_v56  ;;  %2328 = vst [vmem:[#allocation45_spill] sm:$0xff] %v1835_v62  ;;  %v1845_v58 = vld [vmem:[%s2287_s1 + $0x318] sm:$0xff]  ;;  %v1850_v60 = vld [vmem:[%s2287_s1 + $0x320] sm:$0xff] }
  0x36   : > { %2329 = vst [vmem:[#allocation46_spill] sm:$0xff] %v1840_v63  ;;  %2330 = vst [vmem:[#allocation47_spill] sm:$0xff] %v1845_v58  ;;  %v1855_v56 = vld [vmem:[%s2287_s1 + $0x328] sm:$0xff]  ;;  %v1860_v62 = vld [vmem:[%s2287_s1 + $0x330] sm:$0xff] }
  0x37   : > { %2331 = vst [vmem:[#allocation48_spill] sm:$0xff] %v1850_v60  ;;  %2332 = vst [vmem:[#allocation49_spill] sm:$0xff] %v1855_v56  ;;  %v1865_v63 = vld [vmem:[%s2287_s1 + $0x338] sm:$0xff]  ;;  %v1870_v58 = vld [vmem:[%s2287_s1 + $0x340] sm:$0xff] }
  0x38   : > { %2333 = vst [vmem:[#allocation50_spill] sm:$0xff] %v1860_v62  ;;  %2334 = vst [vmem:[#allocation51_spill] sm:$0xff] %v1865_v63  ;;  %v1875_v60 = vld [vmem:[%s2287_s1 + $0x348] sm:$0xff]  ;;  %v1880_v56 = vld [vmem:[%s2287_s1 + $0x350] sm:$0xff] }
  0x39   : > { %2335 = vst [vmem:[#allocation52_spill] sm:$0xff] %v1870_v58  ;;  %2336 = vst [vmem:[#allocation53_spill] sm:$0xff] %v1875_v60  ;;  %v1885_v62 = vld [vmem:[%s2287_s1 + $0x358] sm:$0xff]  ;;  %v1890_v63 = vld [vmem:[%s2287_s1 + $0x360] sm:$0xff] }
  0x3a   : > { %2337 = vst [vmem:[#allocation54_spill] sm:$0xff] %v1880_v56  ;;  %2338 = vst [vmem:[#allocation55_spill] sm:$0xff] %v1885_v62  ;;  %v1895_v58 = vld [vmem:[%s2287_s1 + $0x368] sm:$0xff]  ;;  %v1900_v60 = vld [vmem:[%s2287_s1 + $0x370] sm:$0xff] }
  0x3b   : > { %2339 = vst [vmem:[#allocation56_spill] sm:$0xff] %v1890_v63  ;;  %2340 = vst [vmem:[#allocation57_spill] sm:$0xff] %v1895_v58  ;;  %v1905_v56 = vld [vmem:[%s2287_s1 + $0x378] sm:$0xff]  ;;  %v1910_v62 = vld [vmem:[%s2287_s1 + $0x380] sm:$0xff] }
  0x3c   : > { %2341 = vst [vmem:[#allocation58_spill] sm:$0xff] %v1900_v60  ;;  %2342 = vst [vmem:[#allocation59_spill] sm:$0xff] %v1905_v56  ;;  %v1915_v63 = vld [vmem:[%s2287_s1 + $0x388] sm:$0xff]  ;;  %v1920_v58 = vld [vmem:[%s2287_s1 + $0x390] sm:$0xff] }
  0x3d   : > { %2343 = vst [vmem:[#allocation60_spill] sm:$0xff] %v1910_v62  ;;  %2344 = vst [vmem:[#allocation61_spill] sm:$0xff] %v1915_v63  ;;  %v1925_v60 = vld [vmem:[%s2287_s1 + $0x398] sm:$0xff]  ;;  %v1930_v56 = vld [vmem:[%s2287_s1 + $0x3a0] sm:$0xff] }
  0x3e   : > { %2345 = vst [vmem:[#allocation62_spill] sm:$0xff] %v1920_v58  ;;  %2346 = vst [vmem:[#allocation63_spill] sm:$0xff] %v1925_v60  ;;  %v1935_v62 = vld [vmem:[%s2287_s1 + $0x3a8] sm:$0xff]  ;;  %v1940_v63 = vld [vmem:[%s2287_s1 + $0x3b0] sm:$0xff] }
  0x3f   : > { %2347 = vst [vmem:[#allocation64_spill] sm:$0xff] %v1930_v56  ;;  %2348 = vst [vmem:[#allocation65_spill] sm:$0xff] %v1935_v62  ;;  %v1945_v58 = vld [vmem:[%s2287_s1 + $0x3b8] sm:$0xff]  ;;  %v1950_v60 = vld [vmem:[%s2287_s1 + $0x3c0] sm:$0xff] }
  0x40   : > { %2349 = vst [vmem:[#allocation66_spill] sm:$0xff] %v1940_v63  ;;  %2350 = vst [vmem:[#allocation67_spill] sm:$0xff] %v1945_v58  ;;  %v1955_v56 = vld [vmem:[%s2287_s1 + $0x3c8] sm:$0xff]  ;;  %v1960_v62 = vld [vmem:[%s2287_s1 + $0x3d0] sm:$0xff] }
  0x41   : > { %2351 = vst [vmem:[#allocation68_spill] sm:$0xff] %v1950_v60  ;;  %2352 = vst [vmem:[#allocation69_spill] sm:$0xff] %v1955_v56  ;;  %v1965_v63 = vld [vmem:[%s2287_s1 + $0x3d8] sm:$0xff]  ;;  %v1970_v58 = vld [vmem:[%s2287_s1 + $0x3e0] sm:$0xff] }
  0x42   : > { %2353 = vst [vmem:[#allocation70_spill] sm:$0xff] %v1960_v62  ;;  %2354 = vst [vmem:[#allocation71_spill] sm:$0xff] %v1965_v63  ;;  %v1975_v60 = vld [vmem:[%s2287_s1 + $0x3e8] sm:$0xff]  ;;  %v1980_v56 = vld [vmem:[%s2287_s1 + $0x3f0] sm:$0xff] }
  0x43   : > { %2355 = vst [vmem:[#allocation72_spill] sm:$0xff] %v1970_v58  ;;  %2356 = vst [vmem:[#allocation73_spill] sm:$0xff] %v1975_v60  ;;  %v1985_v62 = vld [vmem:[%s2287_s1 + $0x3f8] sm:$0xff] }
  0x44   : > { %2357 = vst [vmem:[#allocation74_spill] sm:$0xff] %v1980_v56  ;;  %2358 = vst [vmem:[#allocation75_spill] sm:$0xff] %v1985_v62 }
  0x45   : > { %439 = vsyncadd [#allocation3], 16384  ;;  %v1083_v63 = vpack.c.bf16 %v1365_v5, %v1345_v1  ;;  %v1147_v58 = vpack.c.bf16 %v1375_v7, %v1355_v3  ;;  %v1085_v60 = vpack.c.bf16 %v1360_v4, %v1340_v0  ;;  %v1149_v59 = vpack.c.bf16 %v1370_v6, %v1350_v2 }
  0x46   : > { %1290 = dma.done.wait [#allocation3], 16384 }
  0x47   : > { %1291 = vsyncadd [#allocation3], 4294950912  ;;  %v1087_v56 = vpack.c.bf16 %v1405_v13, %v1385_v9  ;;  %v1151_v62 = vpack.c.bf16 %v1415_v15, %v1395_v11  ;;  %1084 = vmatprep.subr.bf16.mxu0 %v1083_v63  ;;  %1148 = vmatprep.subr.bf16.mxu1 %v1147_v58  ;;  %v1089_v1 = vpack.c.bf16 %v1400_v12, %v1380_v8  ;;  %v446_v6 = vld [vmem:[%s1450_s15 + $0x8] sm:$0xff]  ;;  %v2382_v58 = vld [vmem:[#allocation33_spill] sm:$0xff] }
  0x48   : > { %1086 = vmatpush1.bf16.msra.mxu0 %v1085_v60  ;;  %1150 = vmatpush1.bf16.msra.mxu1 %v1149_v59  ;;  %v1153_v0 = vpack.c.bf16 %v1410_v14, %v1390_v10  ;;  %v1091_v2 = vpack.c.bf16 %v1455_v21, %v1425_v17  ;;  %v1155_v3 = vpack.c.bf16 %v1465_v23, %v1440_v19  ;;  %v2383_v60 = vld [vmem:[#allocation31_spill] sm:$0xff]  ;;  %v2385_v63 = vld [vmem:[#allocation28_spill] sm:$0xff] }
  0x49   : > { %1088 = vmatprep.subr.bf16.mxu0 %v1087_v56  ;;  %1152 = vmatprep.subr.bf16.mxu1 %v1151_v62  ;;  %v1093_v4 = vpack.c.bf16 %v1445_v20, %v1420_v16  ;;  %v1157_v5 = vpack.c.bf16 %v1460_v22, %v1435_v18  ;;  %v1095_v7 = vpack.c.bf16 %v1495_v29, %v1475_v25  ;;  %v2360_v25 = vld [vmem:[#allocation11_spill] sm:$0xff] }
  0x4a   : > { %v1159_v8 = vpack.c.bf16 %v1505_v31, %v1485_v27  ;;  %649 = vmatprep.mubr.f32.mxu0 %v446_v6  ;;  %750 = vmatprep.mubr.f32.mxu1 %v446_v6  ;;  %v1097_v9 = vpack.c.bf16 %v1490_v28, %v1470_v24  ;;  %v1161_v10 = vpack.c.bf16 %v1500_v30, %v1480_v26  ;;  %v2359_v24 = vld [vmem:[#allocation8_spill] sm:$0xff]  ;;  %v2361_v27 = vld [vmem:[#allocation6_spill] sm:$0xff]  ;;  %v2362_v28 = vld [vmem:[#allocation9_spill] sm:$0xff] }
  0x4b   : > { %v1099_v11 = vpack.c.bf16 %v1535_v37, %v1515_v33  ;;  %v1163_v12 = vpack.c.bf16 %v1545_v39, %v1525_v35  ;;  %v1101_v13 = vpack.c.bf16 %v1530_v36, %v1510_v32  ;;  %v1165_v14 = vpack.c.bf16 %v1540_v38, %v1520_v34  ;;  %v2363_v30 = vld [vmem:[#allocation7_spill] sm:$0xff]  ;;  %v2364_v31 = vld [vmem:[#allocation10_spill] sm:$0xff]  ;;  %v2365_v33 = vld [vmem:[#allocation13_spill] sm:$0xff] }
  0x4c   : > { %1090 = vmatpush1.bf16.msra.mxu0 %v1089_v1  ;;  %1154 = vmatpush1.bf16.msra.mxu1 %v1153_v0  ;;  %v1103_v15 = vpack.c.bf16 %v1575_v45, %v1555_v41  ;;  %v1167_v16 = vpack.c.bf16 %v1585_v47, %v1565_v43  ;;  %v1105_v17 = vpack.c.bf16 %v1570_v44, %v1550_v40  ;;  %v2366_v34 = vld [vmem:[#allocation17_spill] sm:$0xff]  ;;  %v2367_v36 = vld [vmem:[#allocation15_spill] sm:$0xff]  ;;  %v2369_v39 = vld [vmem:[#allocation12_spill] sm:$0xff] }
  0x4d   : > { %1092 = vmatprep.subr.bf16.mxu0 %v1091_v2  ;;  %1156 = vmatprep.subr.bf16.mxu1 %v1155_v3  ;;  %v1169_v18 = vpack.c.bf16 %v1580_v46, %v1560_v42  ;;  %v1107_v19 = vpack.c.bf16 %v1615_v53, %v1595_v49  ;;  %v1171_v20 = vpack.c.bf16 %v1625_v55, %v1605_v51  ;;  %v2368_v37 = vld [vmem:[#allocation19_spill] sm:$0xff]  ;;  %v2370_v40 = vld [vmem:[#allocation16_spill] sm:$0xff]  ;;  %v2371_v42 = vld [vmem:[#allocation14_spill] sm:$0xff] }
  0x4e   : > { %v1109_v21 = vpack.c.bf16 %v1610_v52, %v1590_v48  ;;  %v1173_v22 = vpack.c.bf16 %v1620_v54, %v1600_v50  ;;  %v1111_v23 = vpack.c.bf16 %v1655_v61, %v1635_v57  ;;  %v1175_v26 = vpack.c.bf16 %v2360_v25, %v2359_v24  ;;  %v2372_v43 = vld [vmem:[#allocation18_spill] sm:$0xff]  ;;  %v2373_v45 = vld [vmem:[#allocation21_spill] sm:$0xff]  ;;  %v2375_v48 = vld [vmem:[#allocation23_spill] sm:$0xff] }
  0x4f   : > { %v1113_v29 = vpack.c.bf16 %v2362_v28, %v2361_v27  ;;  %v1177_v32 = vpack.c.bf16 %v2364_v31, %v2363_v30  ;;  %v1115_v35 = vpack.c.bf16 %v2366_v34, %v2365_v33  ;;  %v1179_v38 = vpack.c.bf16 %v2368_v37, %v2367_v36  ;;  %v2374_v46 = vld [vmem:[#allocation25_spill] sm:$0xff]  ;;  %v2376_v49 = vld [vmem:[#allocation27_spill] sm:$0xff]  ;;  %v2377_v51 = vld [vmem:[#allocation20_spill] sm:$0xff] }
  0x50   : > { %1094 = vmatpush1.bf16.msra.mxu0 %v1093_v4  ;;  %1158 = vmatpush1.bf16.msra.mxu1 %v1157_v5  ;;  %v1117_v41 = vpack.c.bf16 %v2370_v40, %v2369_v39  ;;  %v1181_v44 = vpack.c.bf16 %v2372_v43, %v2371_v42  ;;  %v1119_v47 = vpack.c.bf16 %v2374_v46, %v2373_v45  ;;  %v2378_v52 = vld [vmem:[#allocation24_spill] sm:$0xff]  ;;  %v2379_v54 = vld [vmem:[#allocation22_spill] sm:$0xff]  ;;  %v2381_v57 = vld [vmem:[#allocation29_spill] sm:$0xff] }
  0x51   : > { %1096 = vmatprep.subr.bf16.mxu0 %v1095_v7  ;;  %1160 = vmatprep.subr.bf16.mxu1 %v1159_v8  ;;  %v1183_v50 = vpack.c.bf16 %v2376_v49, %v2375_v48  ;;  %v1121_v53 = vpack.c.bf16 %v2378_v52, %v2377_v51  ;;  %v2380_v55 = vld [vmem:[#allocation26_spill] sm:$0xff]  ;;  %v1123_v59 = vpack.c.bf16 %v2382_v58, %v2381_v57  ;;  %v2384_v61 = vld [vmem:[#allocation35_spill] sm:$0xff]  ;;  %v2386_v1 = vld [vmem:[#allocation32_spill] sm:$0xff] }
  0x52   : > { %v1185_v56 = vpack.c.bf16 %v2380_v55, %v2379_v54  ;;  %v1187_v62 = vpack.c.bf16 %v2384_v61, %v2383_v60  ;;  %v1125_v0 = vpack.c.bf16 %v2386_v1, %v2385_v63  ;;  %v2387_v2 = vld [vmem:[#allocation30_spill] sm:$0xff]  ;;  %v2389_v5 = vld [vmem:[#allocation37_spill] sm:$0xff]  ;;  %v2391_v8 = vld [vmem:[#allocation39_spill] sm:$0xff] }
  0x53   : > { %v2388_v3 = vld [vmem:[#allocation34_spill] sm:$0xff]  ;;  %v2390_v6 = vld [vmem:[#allocation41_spill] sm:$0xff]  ;;  %v2402_v24 = vld [vmem:[#allocation48_spill] sm:$0xff] }
  0x54   : > { %1098 = vmatpush1.bf16.msra.mxu0 %v1097_v9  ;;  %1162 = vmatpush1.bf16.msra.mxu1 %v1161_v10  ;;  %v1189_v4 = vpack.c.bf16 %v2388_v3, %v2387_v2  ;;  %v1127_v7 = vpack.c.bf16 %v2390_v6, %v2389_v5  ;;  %v2392_v9 = vld [vmem:[#allocation43_spill] sm:$0xff]  ;;  %v2404_v27 = vld [vmem:[#allocation50_spill] sm:$0xff]  ;;  %v2406_v30 = vld [vmem:[#allocation57_spill] sm:$0xff] }
  0x55   : > { %1100 = vmatprep.subr.bf16.mxu0 %v1099_v11  ;;  %1164 = vmatprep.subr.bf16.mxu1 %v1163_v12  ;;  %v1191_v10 = vpack.c.bf16 %v2392_v9, %v2391_v8  ;;  %v2393_v11 = vld [vmem:[#allocation36_spill] sm:$0xff]  ;;  %v2408_v33 = vld [vmem:[#allocation59_spill] sm:$0xff]  ;;  %v2412_v39 = vld [vmem:[#allocation58_spill] sm:$0xff] }
  0x56   : > { %v2394_v12 = vld [vmem:[#allocation40_spill] sm:$0xff]  ;;  %v2414_v42 = vld [vmem:[#allocation65_spill] sm:$0xff]  ;;  %v2416_v45 = vld [vmem:[#allocation67_spill] sm:$0xff] }
  0x57   : > { %v2410_v36 = vld [vmem:[#allocation56_spill] sm:$0xff]  ;;  %v2420_v51 = vld [vmem:[#allocation66_spill] sm:$0xff]  ;;  %v2422_v54 = vld [vmem:[#allocation73_spill] sm:$0xff] }
  0x58   : > { %1102 = vmatpush1.bf16.msra.mxu0 %v1101_v13  ;;  %1166 = vmatpush1.bf16.msra.mxu1 %v1165_v14  ;;  %v1129_v13 = vpack.c.bf16 %v2394_v12, %v2393_v11  ;;  %v2395_v14 = vld [vmem:[#allocation38_spill] sm:$0xff]  ;;  %v2418_v48 = vld [vmem:[#allocation64_spill] sm:$0xff]  ;;  %v2424_v57 = vld [vmem:[#allocation75_spill] sm:$0xff] }
  0x59   : > { %1104 = vmatprep.subr.bf16.mxu0 %v1103_v15  ;;  %1168 = vmatprep.subr.bf16.mxu1 %v1167_v16  ;;  %v2396_v15 = vld [vmem:[#allocation42_spill] sm:$0xff]  ;;  %v2426_v60 = vld [vmem:[#allocation72_spill] sm:$0xff]  ;;  %v448_v2 = vld [vmem:[%s1450_s15 + $0x18] sm:$0xff] }
  0x5a   : > { %v1193_v16 = vpack.c.bf16 %v2396_v15, %v2395_v14  ;;  %v2428_v63 = vld [vmem:[#allocation74_spill] sm:$0xff]  ;;  %v447_v3 = vld [vmem:[%s1450_s15 + $0x10] sm:$0xff]  ;;  %v452_v6 = vld [vmem:[%s1450_s15 + $0x38] sm:$0xff] }
  0x5b   : > { %v449_v5 = vld [vmem:[%s1450_s15 + $0x20] sm:$0xff]  ;;  %v454_v8 = vld [vmem:[%s1450_s15 + $0x48] sm:$0xff]  ;;  %v455_v11 = vld [vmem:[%s1450_s15 + $0x50] sm:$0xff] }
  0x5c   : > { %1106 = vmatpush1.bf16.msra.mxu0 %v1105_v17  ;;  %1170 = vmatpush1.bf16.msra.mxu1 %v1169_v18  ;;  %v2397_v17 = vld [vmem:[#allocation45_spill] sm:$0xff]  ;;  %v453_v9 = vld [vmem:[%s1450_s15 + $0x40] sm:$0xff] }
  0x5d   : > { %1108 = vmatprep.subr.bf16.mxu0 %v1107_v19  ;;  %1172 = vmatprep.subr.bf16.mxu1 %v1171_v20  ;;  %v2398_v18 = vld [vmem:[#allocation49_spill] sm:$0xff]  ;;  %v2399_v20 = vld [vmem:[#allocation47_spill] sm:$0xff] }
  0x5e   : > { %v1131_v19 = vpack.c.bf16 %v2398_v18, %v2397_v17 }
  0x60   : > { %1110 = vmatpush1.bf16.msra.mxu0 %v1109_v21  ;;  %1174 = vmatpush1.bf16.msra.mxu1 %v1173_v22  ;;  %v2400_v21 = vld [vmem:[#allocation51_spill] sm:$0xff] }
  0x61   : > { %1112 = vmatprep.subr.bf16.mxu0 %v1111_v23  ;;  %1176 = vmatprep.subr.bf16.mxu1 %v1175_v26  ;;  %v1195_v22 = vpack.c.bf16 %v2400_v21, %v2399_v20  ;;  %v2401_v23 = vld [vmem:[#allocation44_spill] sm:$0xff]  ;;  %v2403_v26 = vld [vmem:[#allocation46_spill] sm:$0xff] }
  0x62   : > { %v1133_v25 = vpack.c.bf16 %v2402_v24, %v2401_v23  ;;  %v1197_v28 = vpack.c.bf16 %v2404_v27, %v2403_v26 }
  0x64   : > { %1114 = vmatpush1.bf16.msra.mxu0 %v1113_v29  ;;  %1178 = vmatpush1.bf16.msra.mxu1 %v1177_v32  ;;  %v2405_v29 = vld [vmem:[#allocation53_spill] sm:$0xff]  ;;  %v2407_v32 = vld [vmem:[#allocation55_spill] sm:$0xff] }
  0x65   : > { %1116 = vmatprep.subr.bf16.mxu0 %v1115_v35  ;;  %1180 = vmatprep.subr.bf16.mxu1 %v1179_v38  ;;  %v1135_v31 = vpack.c.bf16 %v2406_v30, %v2405_v29  ;;  %v1199_v34 = vpack.c.bf16 %v2408_v33, %v2407_v32  ;;  %v2409_v35 = vld [vmem:[#allocation52_spill] sm:$0xff]  ;;  %v2411_v38 = vld [vmem:[#allocation54_spill] sm:$0xff] }
  0x66   : > { %v1137_v37 = vpack.c.bf16 %v2410_v36, %v2409_v35  ;;  %v1201_v40 = vpack.c.bf16 %v2412_v39, %v2411_v38 }
  0x68   : > { %1118 = vmatpush1.bf16.msra.mxu0 %v1117_v41  ;;  %1182 = vmatpush1.bf16.msra.mxu1 %v1181_v44  ;;  %v2413_v41 = vld [vmem:[#allocation61_spill] sm:$0xff]  ;;  %v2415_v44 = vld [vmem:[#allocation63_spill] sm:$0xff] }
  0x69   : > { %1120 = vmatprep.subr.bf16.mxu0 %v1119_v47  ;;  %1184 = vmatprep.subr.bf16.mxu1 %v1183_v50  ;;  %v1139_v43 = vpack.c.bf16 %v2414_v42, %v2413_v41  ;;  %v1203_v46 = vpack.c.bf16 %v2416_v45, %v2415_v44  ;;  %v2417_v47 = vld [vmem:[#allocation60_spill] sm:$0xff]  ;;  %v2419_v50 = vld [vmem:[#allocation62_spill] sm:$0xff] }
  0x6a   : > { %v1141_v49 = vpack.c.bf16 %v2418_v48, %v2417_v47  ;;  %v1205_v52 = vpack.c.bf16 %v2420_v51, %v2419_v50 }
  0x6c   : > { %1122 = vmatpush1.bf16.msra.mxu0 %v1121_v53  ;;  %1186 = vmatpush1.bf16.msra.mxu1 %v1185_v56  ;;  %v2421_v53 = vld [vmem:[#allocation69_spill] sm:$0xff]  ;;  %v2423_v56 = vld [vmem:[#allocation71_spill] sm:$0xff] }
  0x6d   : > { %1124 = vmatprep.subr.bf16.mxu0 %v1123_v59  ;;  %1188 = vmatprep.subr.bf16.mxu1 %v1187_v62  ;;  %v1143_v55 = vpack.c.bf16 %v2422_v54, %v2421_v53  ;;  %v1207_v58 = vpack.c.bf16 %v2424_v57, %v2423_v56  ;;  %v2425_v59 = vld [vmem:[#allocation68_spill] sm:$0xff]  ;;  %v2427_v62 = vld [vmem:[#allocation70_spill] sm:$0xff] }
  0x6e   : > { %v1145_v61 = vpack.c.bf16 %v2426_v60, %v2425_v59  ;;  %v1209_v1 = vpack.c.bf16 %v2428_v63, %v2427_v62 }
  0x70   : > { %1126 = vmatpush1.bf16.msra.mxu0 %v1125_v0  ;;  %1190 = vmatpush1.bf16.msra.mxu1 %v1189_v4  ;;  %v445_v0 = vld [vmem:[%s1450_s15] sm:$0xff]  ;;  %v450_v4 = vld [vmem:[%s1450_s15 + $0x28] sm:$0xff] }
  0x71   : > { %1128 = vmatprep.subr.bf16.mxu0 %v1127_v7  ;;  %1192 = vmatprep.subr.bf16.mxu1 %v1191_v10  ;;  %v451_v7 = vld [vmem:[%s1450_s15 + $0x30] sm:$0xff]  ;;  %v456_v10 = vld [vmem:[%s1450_s15 + $0x58] sm:$0xff] }
  0x74   : > { %1130 = vmatpush1.bf16.msra.mxu0 %v1129_v13  ;;  %1194 = vmatpush1.bf16.msra.mxu1 %v1193_v16 }
  0x75   : > { %1132 = vmatprep.subr.bf16.mxu0 %v1131_v19  ;;  %1196 = vmatprep.subr.bf16.mxu1 %v1195_v22 }
  0x78   : > { %1134 = vmatpush1.bf16.msra.mxu0 %v1133_v25  ;;  %1198 = vmatpush1.bf16.msra.mxu1 %v1197_v28 }
  0x79   : > { %1136 = vmatprep.subr.bf16.mxu0 %v1135_v31  ;;  %1200 = vmatprep.subr.bf16.mxu1 %v1199_v34 }
  0x7c   : > { %1138 = vmatpush1.bf16.msra.mxu0 %v1137_v37  ;;  %1202 = vmatpush1.bf16.msra.mxu1 %v1201_v40 }
  0x7d   : > { %1140 = vmatprep.subr.bf16.mxu0 %v1139_v43  ;;  %1204 = vmatprep.subr.bf16.mxu1 %v1203_v46 }
  0x80   : > { %1142 = vmatpush1.bf16.msra.mxu0 %v1141_v49  ;;  %1206 = vmatpush1.bf16.msra.mxu1 %v1205_v52 }
  0x81   : > { %1144 = vmatprep.subr.bf16.mxu0 %v1143_v55  ;;  %1208 = vmatprep.subr.bf16.mxu1 %v1207_v58 }
  0x84   : > { %1146 = vmatpush1.bf16.msra.mxu0 %v1145_v61  ;;  %1210 = vmatpush1.bf16.msra.mxu1 %v1209_v1 }
  0x87   : > { %650 = vmatmul.mubr.f32.vlgmr.msra.gmra.mrb[0].mxu0 %v445_v0  ;;  %751 = vmatmul.mubr.f32.vlgmr.msra.gmra.mrb[0].mxu1 %v445_v0 }
  0x88   : > { %655 = vmatprep.mubr.f32.mxu0 %v448_v2  ;;  %756 = vmatprep.mubr.f32.mxu1 %v448_v2 }
  0x8b   : > { %656 = vmatmul.mubr.f32.gmra.mrb[2].mxu0 %v447_v3  ;;  %757 = vmatmul.mubr.f32.gmra.mrb[2].mxu1 %v447_v3 }
  0x8c   : > { %661 = vmatprep.mubr.f32.mxu0 %v450_v4  ;;  %762 = vmatprep.mubr.f32.mxu1 %v450_v4 }
  0x8f   : > { %662 = vmatmul.mubr.f32.gmra.mrb[4].mxu0 %v449_v5  ;;  %763 = vmatmul.mubr.f32.gmra.mrb[4].mxu1 %v449_v5 }
  0x90   : > { %667 = vmatprep.mubr.f32.mxu0 %v452_v6  ;;  %768 = vmatprep.mubr.f32.mxu1 %v452_v6 }
  0x93   : > { %668 = vmatmul.mubr.f32.gmra.mrb[6].mxu0 %v451_v7  ;;  %769 = vmatmul.mubr.f32.gmra.mrb[6].mxu1 %v451_v7 }
  0x94   : > { %673 = vmatprep.mubr.f32.mxu0 %v454_v8  ;;  %774 = vmatprep.mubr.f32.mxu1 %v454_v8 }
  0x97   : > { %674 = vmatmul.mubr.f32.gmra.mrb[8].mxu0 %v453_v9  ;;  %775 = vmatmul.mubr.f32.gmra.mrb[8].mxu1 %v453_v9 }
  0x98   : > { %679 = vmatprep.mubr.f32.mxu0 %v456_v10  ;;  %780 = vmatprep.mubr.f32.mxu1 %v456_v10 }
  0x9b   : > { %680 = vmatmul.mubr.f32.gmra.mrb[10].mxu0 %v455_v11  ;;  %781 = vmatmul.mubr.f32.gmra.mrb[10].mxu1 %v455_v11 }
 0x15a   : > { %v651_v12 = vpop.f32.mrb[0].mxu0  ;;  %v752_v13 = vpop.f32.mrb[0].mxu1 }
 0x15b   : > { %v787_v14 = vmul.f32 %v651_v12, %v651_v12  ;;  %v793_v15 = vmul.f32 %v752_v13, %v752_v13  ;;  %v653_v16 = vpop.f32.mrb[1].mxu0  ;;  %v754_v17 = vpop.f32.mrb[1].mxu1 }
 0x15c   : > { %v788_v18 = vmul.f32 %v653_v16, %v653_v16  ;;  %v794_v19 = vmul.f32 %v754_v17, %v754_v17 }
 0x15d   : > { %v799_v20 = vadd.f32 %v793_v15, %v787_v14 }
 0x15e   : > { %v800_v21 = vadd.f32 %v794_v19, %v788_v18  ;;  %v657_v22 = vpop.f32.mrb[2].mxu0  ;;  %v758_v23 = vpop.f32.mrb[2].mxu1 }
 0x15f   : > { %v789_v24 = vmul.f32 %v657_v22, %v657_v22  ;;  %v795_v25 = vmul.f32 %v758_v23, %v758_v23  ;;  %v659_v26 = vpop.f32.mrb[3].mxu0  ;;  %v760_v27 = vpop.f32.mrb[3].mxu1  ;;  %v805_v31 = vmax.f32 %v799_v20, 1e-08 }
 0x160   : > { %v790_v28 = vmul.f32 %v659_v26, %v659_v26  ;;  %v796_v29 = vmul.f32 %v760_v27, %v760_v27  ;;  %v806_v35 = vmax.f32 %v800_v21, 1e-08 }
 0x161   : > { %v801_v30 = vadd.f32 %v795_v25, %v789_v24  ;;  %1242 = vlog2.f32 %v805_v31 }
 0x162   : > { %v802_v32 = vadd.f32 %v796_v29, %v790_v28  ;;  %v663_v33 = vpop.f32.mrb[4].mxu0  ;;  %v764_v34 = vpop.f32.mrb[4].mxu1  ;;  %1244 = vlog2.f32 %v806_v35 }
 0x163   : > { %v791_v36 = vmul.f32 %v663_v33, %v663_v33  ;;  %v797_v37 = vmul.f32 %v764_v34, %v764_v34  ;;  %v665_v38 = vpop.f32.mrb[5].mxu0  ;;  %v766_v39 = vpop.f32.mrb[5].mxu1  ;;  %v2127_v40 = vmax.f32 %v801_v30, 1e-08 }
 0x164   : > { %v792_v41 = vmul.f32 %v665_v38, %v665_v38  ;;  %v798_v42 = vmul.f32 %v766_v39, %v766_v39  ;;  %v2129_v43 = vmax.f32 %v802_v32, 1e-08 }
 0x165   : > { %v803_v44 = vadd.f32 %v797_v37, %v791_v36  ;;  %1246 = vlog2.f32 %v2127_v40 }
 0x166   : > { %v804_v45 = vadd.f32 %v798_v42, %v792_v41  ;;  %v669_v46 = vpop.f32.mrb[6].mxu0  ;;  %v770_v47 = vpop.f32.mrb[6].mxu1  ;;  %1248 = vlog2.f32 %v2129_v43 }
 0x167   : > { %v2131_v48 = vmax.f32 %v803_v44, 1e-08  ;;  %v811_v49 = vmul.f32 %v669_v46, %v669_v46  ;;  %v817_v50 = vmul.f32 %v770_v47, %v770_v47  ;;  %v671_v51 = vpop.f32.mrb[7].mxu0  ;;  %v772_v52 = vpop.f32.mrb[7].mxu1 }
 0x168   : > { %v2134_v53 = vmax.f32 %v804_v45, 1e-08  ;;  %v812_v54 = vmul.f32 %v671_v51, %v671_v51  ;;  %v818_v55 = vmul.f32 %v772_v52, %v772_v52 }
 0x169   : > { %v823_v56 = vadd.f32 %v817_v50, %v811_v49  ;;  %1250 = vlog2.f32 %v2131_v48 }
 0x16a   : > { %v824_v57 = vadd.f32 %v818_v55, %v812_v54  ;;  %v675_v58 = vpop.f32.mrb[8].mxu0  ;;  %v776_v59 = vpop.f32.mrb[8].mxu1  ;;  %1252 = vlog2.f32 %v2134_v53 }
 0x16b   : > { %v2138_v60 = vmax.f32 %v823_v56, 1e-08  ;;  %v813_v61 = vmul.f32 %v675_v58, %v675_v58  ;;  %v819_v62 = vmul.f32 %v776_v59, %v776_v59  ;;  %v677_v63 = vpop.f32.mrb[9].mxu0  ;;  %v778_v1 = vpop.f32.mrb[9].mxu1 }
 0x16c   : > { %v2140_v0 = vmax.f32 %v824_v57, 1e-08  ;;  %v814_v2 = vmul.f32 %v677_v63, %v677_v63  ;;  %v820_v3 = vmul.f32 %v778_v1, %v778_v1  ;;  %v1243_v16 = vpop.eup %1242 }
 0x16d   : > { %v2144_v4 = vmul.f32 %v2138_v60, %v805_v31  ;;  %v2147_v5 = vadd.f32 %v2138_v60, %v805_v31  ;;  %1254 = vlog2.f32 %v2138_v60  ;;  %v825_v8 = vadd.f32 %v819_v62, %v813_v61  ;;  %v1245_v19 = vpop.eup %1244 }
 0x16e   : > { %v2151_v6 = vmul.f32 %v2140_v0, %v806_v35  ;;  %v2154_v7 = vadd.f32 %v2140_v0, %v806_v35  ;;  %1256 = vlog2.f32 %v2140_v0  ;;  %v681_v9 = vpop.f32.mrb[10].mxu0  ;;  %v782_v10 = vpop.f32.mrb[10].mxu1  ;;  %v826_v11 = vadd.f32 %v820_v3, %v814_v2 }
 0x16f   : > { %1258 = vrsqrt.f32 %v2144_v4  ;;  %v815_v12 = vmul.f32 %v681_v9, %v681_v9  ;;  %v821_v13 = vmul.f32 %v782_v10, %v782_v10  ;;  %v683_v14 = vpop.f32.mrb[11].mxu0  ;;  %v784_v15 = vpop.f32.mrb[11].mxu1  ;;  %v2159_v17 = vmax.f32 %v825_v8, 1e-08 }
 0x170   : > { %1260 = vrsqrt.f32 %v2151_v6  ;;  %v816_v18 = vmul.f32 %v683_v14, %v683_v14  ;;  %v2161_v20 = vmax.f32 %v826_v11, 1e-08  ;;  %v822_v22 = vmul.f32 %v784_v15, %v784_v15  ;;  %v1247_v23 = vpop.eup %1246 }
 0x171   : > { %v827_v21 = vadd.f32 %v821_v13, %v815_v12  ;;  %v2165_v24 = vmul.f32 %v2159_v17, %v2127_v40  ;;  %1262 = vlog2.f32 %v2159_v17  ;;  %v1249_v25 = vpop.eup %1248  ;;  %v930_v30 = vmul.f32 0.6931472, %v1243_v16 }
 0x172   : > { %v2170_v26 = vmul.f32 %v2161_v20, %v2129_v43  ;;  %1264 = vlog2.f32 %v2161_v20  ;;  %v828_v28 = vadd.f32 %v822_v22, %v816_v18  ;;  %v932_v31 = vmul.f32 0.6931472, %v1245_v19 }
 0x173   : > { %v2173_v27 = vmax.f32 %v827_v21, 1e-08  ;;  %v1251_v29 = vpop.eup %1250  ;;  %v2175_v32 = vmul.f32 0.6931472, %v1247_v23  ;;  %v2184_v36 = vmul.f32 0.6931472, %v1249_v25  ;;  %v2218_v63 = vadd.f32 %v2159_v17, %v2127_v40 }
 0x174   : > { %v2181_v34 = vmax.f32 %v828_v28, 1e-08  ;;  %v1253_v35 = vpop.eup %1252  ;;  %vm843_vm0 = vcmp.eq.f32.partialorder %v2144_v4, inf  ;;  %vm845_vm1 = vcmp.eq.f32.partialorder %v2144_v4, 0.0  ;;  %v2193_v39 = vmul.f32 0.6931472, %v1251_v29 }
 0x175   : > { %v2179_v33 = vmul.f32 %v2173_v27, %v2131_v48  ;;  %1266 = vlog2.f32 %v2173_v27  ;;  %v846_v41 = vand.u32 2147483648, %v2144_v4  ;;  %vm850_vm2 = vcmp.eq.f32.partialorder %v2151_v6, inf }
 0x176   : > { %1268 = vrsqrt.f32 %v2165_v24  ;;  %v2191_v38 = vmul.f32 %v2181_v34, %v2134_v53  ;;  %vm852_vm3 = vcmp.eq.f32.partialorder %v2151_v6, 0.0  ;;  %v2200_v46 = vmul.f32 0.6931472, %v1253_v35 }
 0x177   : > { %v1255_v37 = vpop.eup %1254  ;;  %1270 = vlog2.f32 %v2181_v34  ;;  %v853_v49 = vand.u32 2147483648, %v2151_v6  ;;  %vm857_vm4 = vcmp.eq.f32.partialorder %v2165_v24, inf  ;;  %vm859_vm5 = vcmp.eq.f32.partialorder %v2165_v24, 0.0 }
 0x178   : > { %v1257_v42 = vpop.eup %1256  ;;  %v942_v44 = vmul.f32 0.6931472, %v1255_v37  ;;  %1272 = vrsqrt.f32 %v2170_v26  ;;  %v860_v56 = vand.u32 2147483648, %v2165_v24  ;;  %v867_v57 = vand.u32 2147483648, %v2170_v26 }
 0x179   : > { %v1259_v45 = vpop.eup %1258  ;;  %v944_v47 = vmul.f32 0.6931472, %v1257_v42  ;;  %1274 = vrsqrt.f32 %v2179_v33  ;;  %vm864_vm6 = vcmp.eq.f32.partialorder %v2170_v26, inf  ;;  %v874_v62 = vand.u32 2147483648, %v2179_v33 }
 0x17a   : > { %v1261_v50 = vpop.eup %1260  ;;  %v953_v51 = vsub.f32 %v930_v30, %v942_v44  ;;  %v842_v52 = vmul.f32 %v1259_v45, %v2144_v4  ;;  %1276 = vrsqrt.f32 %v2191_v38  ;;  %vm866_vm7 = vcmp.eq.f32.partialorder %v2170_v26, 0.0 }
 0x17b   : > { %v954_v54 = vsub.f32 %v932_v31, %v944_v47  ;;  %v849_v55 = vmul.f32 %v1261_v50, %v2151_v6  ;;  %v1263_v58 = vpop.eup %1262  ;;  %vm871_vm8 = vcmp.eq.f32.partialorder %v2179_v33, inf  ;;  %vm873_vm9 = vcmp.eq.f32.partialorder %v2179_v33, 0.0 }
 0x17c   : > { %v959_v59 = vand.u32 2147483647, %v953_v51  ;;  %v844_v61 = vsel %vm843_vm0, %v2144_v4, %v842_v52  ;;  %v1265_v1 = vpop.eup %1264  ;;  %v946_v2 = vmul.f32 0.6931472, %v1263_v58  ;;  %vm878_vm10 = vcmp.eq.f32.partialorder %v2191_v38, inf }
 0x17d   : > { %v960_v3 = vand.u32 2147483647, %v954_v54  ;;  %v847_v8 = vsel %vm845_vm1, %v846_v41, %v844_v61  ;;  %v851_v9 = vsel %vm850_vm2, %v2151_v6, %v849_v55  ;;  %v948_v10 = vmul.f32 0.6931472, %v1265_v1 }
 0x17e   : > { %v854_v11 = vsel %vm852_vm3, %v853_v49, %v851_v9  ;;  %v886_v40 = vadd.f32 %v2161_v20, %v2129_v43  ;;  %v887_v4 = vadd.f32 %v2173_v27, %v2131_v48  ;;  %v955_v13 = vsub.f32 %v2175_v32, %v946_v2 }
 0x17f   : > { %v1267_v12 = vpop.eup %1266  ;;  %v965_v14 = vadd.f32 %v960_v3, %v959_v59  ;;  %vm880_vm11 = vcmp.eq.f32.partialorder %v2191_v38, 0.0  ;;  %v888_v6 = vadd.f32 %v2181_v34, %v2134_v53  ;;  %v889_v15 = vmul.f32 2.0, %v847_v8 }
 0x180   : > { %v1269_v16 = vpop.eup %1268  ;;  %v950_v18 = vmul.f32 0.6931472, %v1267_v12  ;;  %v956_v19 = vsub.f32 %v2184_v36, %v948_v10  ;;  %v890_v21 = vmul.f32 2.0, %v854_v11  ;;  %v915_v43 = vadd.f32 %v2140_v0, %v2138_v60 }
 0x181   : > { %v1271_v22 = vpop.eup %1270  ;;  %v961_v48 = vand.u32 2147483647, %v955_v13  ;;  %v856_v23 = vmul.f32 %v1269_v16, %v2165_v24  ;;  %v881_v25 = vand.u32 2147483648, %v2191_v38  ;;  %v895_v28 = vsub.f32 %v2147_v5, %v889_v15 }
 0x182   : > { %v1273_v29 = vpop.eup %1272  ;;  %v952_v30 = vmul.f32 0.6931472, %v1271_v22  ;;  %v957_v53 = vsub.f32 %v2193_v39, %v950_v18  ;;  %v962_v31 = vand.u32 2147483647, %v956_v19  ;;  %v896_v32 = vsub.f32 %v2154_v7, %v890_v21 }
 0x183   : > { %v1275_v35 = vpop.eup %1274  ;;  %v966_v36 = vadd.f32 %v965_v14, %v961_v48  ;;  %v858_v60 = vsel %vm857_vm4, %v2165_v24, %v856_v23  ;;  %v863_v0 = vmul.f32 %v1273_v29, %v2170_v26  ;;  %v916_v37 = vadd.f32 %v915_v43, %v2159_v17 }
 0x184   : > { %v1277_v41 = vpop.eup %1276  ;;  %v958_v5 = vsub.f32 %v2200_v46, %v952_v30  ;;  %v963_v42 = vand.u32 2147483647, %v957_v53  ;;  %v861_v39 = vsel %vm859_vm5, %v860_v56, %v858_v60  ;;  %v870_v44 = vmul.f32 %v1275_v35, %v2179_v33 }
 0x185   : > { %v967_v7 = vadd.f32 %v966_v36, %v962_v31  ;;  %v865_v45 = vsel %vm864_vm6, %v2170_v26, %v863_v0  ;;  %v877_v47 = vmul.f32 %v1277_v41, %v2191_v38  ;;  %v891_v49 = vmul.f32 2.0, %v861_v39 }
 0x186   : > { %v964_v50 = vand.u32 2147483647, %v958_v5  ;;  %v868_v17 = vsel %vm866_vm7, %v867_v57, %v865_v45  ;;  %v872_v46 = vsel %vm871_vm8, %v2179_v33, %v870_v44  ;;  %v901_v24 = vadd.f32 %v896_v32, %v895_v28 }
 0x187   : > { %v968_v51 = vadd.f32 %v967_v7, %v963_v42  ;;  %v875_v52 = vsel %vm873_vm9, %v874_v62, %v872_v46  ;;  %v879_v54 = vsel %vm878_vm10, %v2191_v38, %v877_v47  ;;  %v892_v55 = vmul.f32 2.0, %v868_v17 }
 0x188   : > { %v882_v56 = vsel %vm880_vm11, %v881_v25, %v879_v54  ;;  %v893_v58 = vmul.f32 2.0, %v875_v52  ;;  %v897_v26 = vsub.f32 %v2218_v63, %v891_v49  ;;  %v917_v57 = vadd.f32 %v916_v37, %v2161_v20 }
 0x189   : > { %v969_v59 = vadd.f32 %v968_v51, %v964_v50  ;;  %v894_v61 = vmul.f32 2.0, %v882_v56  ;;  %v898_v1 = vsub.f32 %v886_v40, %v892_v55  ;;  %v980_v28 = vlaneseq }
 0x18a   : > { %v899_v2 = vsub.f32 %v887_v4, %v893_v58  ;;  %v902_v3 = vadd.f32 %v901_v24, %v897_v26  ;;  %v918_v33 = vadd.f32 %v917_v57, %v2173_v27 }
 0x18b   : > { %970 = vadd.xlane.f32.xlu1 %v969_v59  ;;  %v900_v62 = vsub.f32 %v888_v6, %v894_v61  ;;  %v981_v29 = vshrl.u32 %v980_v28, 7 }
 0x18c   : > { %v903_v8 = vadd.f32 %v902_v3, %v898_v1  ;;  %v919_v9 = vadd.f32 %v918_v33, %v2181_v34 }
 0x18d   : > { %vm982_vm12 = vcmp.eq.s32.totalorder %v981_v29, 0  ;;  %vm985_vm13 = vcmp.eq.s32.totalorder %v981_v29, 1  ;;  %vm989_vm14 = vcmp.eq.s32.totalorder %v981_v29, 2 }
 0x18e   : > { %v904_v10 = vadd.f32 %v903_v8, %v899_v2 }
 0x190   : > { %v905_v38 = vadd.f32 %v904_v10, %v900_v62 }
 0x192   : > { %906 = vadd.xlane.f32.xlu0 %v905_v38 }
 0x196   : > { %920 = vadd.xlane.f32.xlu0 %v919_v9 }
 0x218   : > { %v971_v11 = vpop.xlane.xlu1 %970 }
 0x219   : > { %v972_v63 = vrot.slane %v971_v11, 4 }
 0x21b   : > { %v973_v12 = vadd.f32 %v972_v63, %v971_v11 }
 0x21d   : > { %v974_v40 = vrot.slane %v973_v12, 2 }
 0x21f   : > { %v907_v20 = vpop.xlane.xlu0 %906  ;;  %v975_v6 = vadd.f32 %v974_v40, %v973_v12 }
 0x220   : > { %v908_v13 = vrot.slane %v907_v20, 4 }
 0x221   : > { %v976_v22 = vrot.slane %v975_v6, 1 }
 0x222   : > { %v909_v14 = vadd.f32 %v908_v13, %v907_v20 }
 0x223   : > { %v921_v4 = vpop.xlane.xlu0 %920  ;;  %v977_v25 = vadd.f32 %v976_v22, %v975_v6 }
 0x224   : > { %v910_v15 = vrot.slane %v909_v14, 2  ;;  %v922_v16 = vrot.slane %v921_v4, 4 }
 0x226   : > { %v923_v27 = vadd.f32 %v922_v16, %v921_v4  ;;  %v911_v18 = vadd.f32 %v910_v15, %v909_v14 }
 0x228   : > { %v924_v19 = vrot.slane %v923_v27, 2  ;;  %v912_v21 = vrot.slane %v911_v18, 1 }
 0x22a   : > { %v925_v34 = vadd.f32 %v924_v19, %v923_v27  ;;  %v913_v43 = vadd.f32 %v912_v21, %v911_v18 }
 0x22c   : > { %1211 = vpush %v913_v43  ;;  %v926_v48 = vrot.slane %v925_v34, 1 }
 0x22e   : > { %v927_v23 = vadd.f32 %v926_v48, %v925_v34 }
 0x230   : > { %1213 = vpush %v927_v23 }
 0x231   : > { %1215 = vpush %v977_v25 }
 0x25d   : > { %s1212_s15 = spop %1211 }
 0x25e   : > { %v983_v30 = vstv %s1212_s15 }
 0x25f   : > { %v984_v31 = vsel %vm982_vm12, %v983_v30, 0.0 }
 0x261   : > { %s1214_s23 = spop %1213 }
 0x262   : > { %v986_v53 = vstv %s1214_s23  ;;  %s1216_s24 = spop %1215 }
 0x263   : > { %v987_v32 = vsel %vm985_vm13, %v986_v53, 0.0  ;;  %s979_s25 = smul.f32 0.5, %s1216_s24 }
 0x264   : > { %v988_v35 = vadd.f32 %v987_v32, %v984_v31 }
 0x265   : > { %v990_v36 = vstv %s979_s25 }
 0x266   : > { %v991_v60 = vsel %vm989_vm14, %v990_v36, 0.0 }
 0x267   : > { %v992_v0 = vadd.f32 %v991_v60, %v988_v35 }
 0x269   : > { %995 = vst [vmem:[%s1430_s9] sm:$0xff] %v992_v0 }
 0x26a PF: > { %s12_s11 = sadd.s32 1, %s1302_s11   ;;  %s2429_s9 = smov %s1298_s10 }
 0x26b   : > { %p9_p6 = scmp.ge.s32.totalorder %s12_s11, 4   ;;  %s2430_s10 = smov %s2432_s12 }
 0x26d   :  { %11 = sbr.rel (!%p9_p6) target bundleno = 2 (0x2), region = 100 }
 0x274   :  { %1015 = vsyncmov [#allocation3] }
 0x277   :  { %s1016_s26 = vpop.sfrf %1015 }
 0x278   :  { %p1081_p7 = scmp.ne.s32.totalorder %s1016_s26, 0 }
 0x27a   :  { %1020 = shalt.err (%p1081_p7)  }

</bundles_post_ra>
